<compile_context>
chip_gen: v7x
topology: tpu7x:2x2x1
jax: 0.10.0
libtpu: 0.0.40
codegen_flags: <defaults>
</compile_context>

<pallas_src>
import jax
import jax.numpy as jnp
from jax.experimental import pallas as pl
from jax.experimental.pallas import tpu as pltpu

BERT_HIDDEN = 768
HIDDEN1 = 256
N_CLASSES = 52
N_CLASSES_PAD = 128          # lane-dense output width (multiple of 128)
NEG_BIG = -1e30              # bias for padded classes -> exp underflows to 0
SUBLANE = 16                 # bf16 rows pack 16/sublane-tile; tile rows % 16 == 0


def fused_head_kernel(x_ref, pw_ref, pb_ref, w1_ref, b1_ref, w2_ref, b2_ref,
                      out_ref):
    """Fused pooler-tail + classifier head for one batch tile.

    x_ref : (TB, 768)  bf16  masked-mean features (pre-pooler-tail)
    pw_ref: (768, 768) bf16  pooler weight
    pb_ref: (1, 768)   f32   pooler bias
    w1_ref: (768, 256) bf16
    b1_ref: (1, 256)   f32
    w2_ref: (256, 128) bf16  (columns 52..127 are zero)
    b2_ref: (1, 128)   f32   (entries 52..127 are -1e30)
    out_ref:(TB, 128)  f32   softmax probabilities (padded classes ~0)
    """
    x = x_ref[...]  # already bf16 (MXU-native)

    # Pooler tail: tanh(x @ Wp + bp)  -- bf16 MXU, f32 accumulate, f32 tanh.
    pooled = jnp.tanh(
        jnp.dot(x, pw_ref[...], preferred_element_type=jnp.float32)
        + pb_ref[...])

    # Dropout is identity at inference time.
    # TODO(synk): training-mode dropout (args.do_prob) via pltpu.prng_seed /
    # pltpu.prng_random_bits is not implemented.

    # Linear(768 -> 256) + ReLU.
    h = jnp.dot(pooled.astype(jnp.bfloat16), w1_ref[...],
                preferred_element_type=jnp.float32) + b1_ref[...]
    h = jnp.maximum(h, 0.0)

    # Linear(256 -> 128 padded).  Padded logits == -1e30.
    logits = jnp.dot(h.astype(jnp.bfloat16), w2_ref[...],
                     preferred_element_type=jnp.float32) + b2_ref[...]

    # Numerically-stable softmax over the class axis (matches F.softmax dim=1
    # for 2-D input).  exp(-1e30 - m) underflows to 0, so the padded classes
    # contribute no probability mass.
    m = jnp.max(logits, axis=-1, keepdims=True)
    e = jnp.exp(logits - m)
    inv_denom = pl.reciprocal(jnp.sum(e, axis=-1, keepdims=True), approx=True)
    out_ref[...] = (e * inv_denom).astype(out_ref.dtype)


def pad_class_params(w2, b2):
    """One-time padding of the final layer 52 -> 128 classes (hoisted out of
    the per-call launch path)."""
    w2p = jnp.zeros((HIDDEN1, N_CLASSES_PAD), w2.dtype).at[:, :N_CLASSES].set(w2)
    b2p = jnp.full((1, N_CLASSES_PAD), NEG_BIG,
                   jnp.float32).at[:, :N_CLASSES].set(b2.astype(jnp.float32))
    return w2p, b2p


def _batch_tiling(batch, block_b):
    """Balanced batch tiling.

    - n_tiles is the minimum needed to respect block_b, forced up to an even
      count >= 2 when the batch is big enough (>= 2 sublane tiles) so that the
      "parallel" grid axis actually shards across v7x's 2 TensorCores.
    - tb is balanced (ceil(B / n_tiles)) and rounded to a multiple of 16 so
      padding waste is at most n_tiles * 15 rows instead of a whole block.
    """
    n_tiles = pl.cdiv(batch, block_b)
    if batch >= 2 * SUBLANE:
        n_tiles = max(n_tiles, 2)
        if n_tiles % 2:
            n_tiles += 1
    tb = pl.cdiv(pl.cdiv(batch, n_tiles), SUBLANE) * SUBLANE
    return tb, n_tiles * tb


def classifier_forward(feat, pool_w, pool_b, w1, b1, w2p, b2p, *, block_b=1024):
    """feat: (B, 768) features (any float dtype; cast to bf16 at the boundary).
    w2p/b2p: pre-padded final layer (see pad_class_params).
    Returns (B, 52) f32 softmax probabilities."""
    B = feat.shape[0]
    tb, b_pad = _batch_tiling(B, block_b)

    feat = feat.astype(jnp.bfloat16)
    if b_pad != B:
        feat = jnp.pad(feat, ((0, b_pad - B), (0, 0)))

    const = lambda i: (0, 0)
    flops = 2 * b_pad * (BERT_HIDDEN * BERT_HIDDEN
                         + BERT_HIDDEN * HIDDEN1
                         + HIDDEN1 * N_CLASSES_PAD)
    bytes_accessed = (feat.size * 2                                     # bf16 in
                      + (pool_w.size + w1.size + w2p.size) * 2          # bf16 W
                      + (pool_b.size + b1.size + b2p.size) * 4          # f32 b
                      + b_pad * N_CLASSES_PAD * 4)                      # f32 out

    out = pl.pallas_call(
        fused_head_kernel,
        out_shape=jax.ShapeDtypeStruct((b_pad, N_CLASSES_PAD), jnp.float32),
        grid_spec=pltpu.PrefetchScalarGridSpec(
            num_scalar_prefetch=0,
            grid=(b_pad // tb,),
            in_specs=[
                pl.BlockSpec((tb, BERT_HIDDEN), lambda i: (i, 0)),
                pl.BlockSpec((BERT_HIDDEN, BERT_HIDDEN), const),
                pl.BlockSpec((1, BERT_HIDDEN), const),
                pl.BlockSpec((BERT_HIDDEN, HIDDEN1), const),
                pl.BlockSpec((1, HIDDEN1), const),
                pl.BlockSpec((HIDDEN1, N_CLASSES_PAD), const),
                pl.BlockSpec((1, N_CLASSES_PAD), const),
            ],
            out_specs=pl.BlockSpec((tb, N_CLASSES_PAD), lambda i: (i, 0)),
        ),
        compiler_params=pltpu.CompilerParams(
            dimension_semantics=("parallel",),
            vmem_limit_bytes=48 << 20),
        cost_estimate=pl.CostEstimate(
            flops=flops,
            transcendentals=b_pad * (BERT_HIDDEN + N_CLASSES_PAD + 1),
            bytes_accessed=bytes_accessed),
    )(feat, pool_w, pool_b, w1, b1, w2p, b2p)

    return out[:B, :N_CLASSES]


# ---------------------------------------------------------------------------
# Deterministic synthetic stand-in for the BERT encoder body.
# TODO(synk): the real pretrained transformer encoder has no in-script Pallas
# equivalent; this plain-JAX stub only reproduces the (B, 768) feature shape.
# ---------------------------------------------------------------------------
def synthetic_bert_features(ids, mask, emb_table):
    emb = emb_table[ids]                                    # (B, S, 768)
    m = mask.astype(jnp.float32)[..., None]                 # (B, S, 1)
    feat = (emb * m).sum(axis=1) / jnp.maximum(m.sum(axis=1), 1.0)
    return feat.astype(jnp.bfloat16)                        # bf16 features


def init_params(key):
    k = jax.random.split(key, 6)
    vocab = 128

    def uniform(kk, shape, fan_in, dtype):
        bound = 1.0 / jnp.sqrt(jnp.float32(fan_in))
        return jax.random.uniform(kk, shape, jnp.float32, -bound, bound).astype(dtype)

    emb_table = jax.random.normal(k[0], (vocab, BERT_HIDDEN), jnp.float32) * 0.02
    # Weights stored in bf16 (MXU-native); biases kept in f32 for the epilogue.
    pool_w = uniform(k[1], (BERT_HIDDEN, BERT_HIDDEN), BERT_HIDDEN, jnp.bfloat16)
    pool_b = jnp.zeros((1, BERT_HIDDEN), jnp.float32)
    w1 = uniform(k[2], (BERT_HIDDEN, HIDDEN1), BERT_HIDDEN, jnp.bfloat16)
    b1 = uniform(k[3], (1, HIDDEN1), BERT_HIDDEN, jnp.float32)
    w2 = uniform(k[4], (HIDDEN1, N_CLASSES), HIDDEN1, jnp.bfloat16)
    b2 = uniform(k[5], (1, N_CLASSES), HIDDEN1, jnp.float32)
    return emb_table, pool_w, pool_b, w1, b1, w2, b2


def reference_forward(feat, pool_w, pool_b, w1, b1, w2, b2):
    """Plain-JAX reference with the same bf16-operand / f32-accumulate math."""
    pooled = jnp.tanh(
        jnp.dot(feat.astype(jnp.bfloat16), pool_w,
                preferred_element_type=jnp.float32) + pool_b)
    h = jnp.maximum(
        jnp.dot(pooled.astype(jnp.bfloat16), w1,
                preferred_element_type=jnp.float32) + b1, 0.0)
    logits = jnp.dot(h.astype(jnp.bfloat16), w2,
                     preferred_element_type=jnp.float32) + b2
    return jax.nn.softmax(logits, axis=-1)


if __name__ == "__main__":
    key = jax.random.PRNGKey(0)
    k_ids, k_param = jax.random.split(key)

    emb_table, pool_w, pool_b, w1, b1, w2, b2 = init_params(k_param)
    w2p, b2p = pad_class_params(w2, b2)     # one-time class-dim padding

    # --- small-shape check (single grid step) ---
    B, S = 4, 8
    ids = jax.random.randint(k_ids, (B, S), 0, 128, dtype=jnp.int32)
    mask = jnp.ones((B, S), dtype=jnp.int32)

    feat = synthetic_bert_features(ids, mask, emb_table)          # (B, 768) bf16
    out = classifier_forward(feat, pool_w, pool_b, w1, b1, w2p, b2p)
    out = jax.block_until_ready(out)

    assert out.shape == (B, N_CLASSES)
    assert bool(jnp.all(jnp.isfinite(out)))
    assert bool(jnp.allclose(jnp.sum(out, axis=-1), 1.0, atol=5e-3))

    ref = reference_forward(feat, pool_w, pool_b, w1, b1, w2, b2)
    assert bool(jnp.allclose(out, ref, atol=5e-3, rtol=5e-3))

    # --- multi-tile check (grid of 2 parallel steps + row-pad slicing) ---
    B2, S2 = 40, 8
    ids2 = jax.random.randint(jax.random.PRNGKey(1), (B2, S2), 0, 128,
                              dtype=jnp.int32)
    mask2 = jnp.ones((B2, S2), dtype=jnp.int32)
    feat2 = synthetic_bert_features(ids2, mask2, emb_table)
    out2 = jax.block_until_ready(
        classifier_forward(feat2, pool_w, pool_b, w1, b1, w2p, b2p))
    ref2 = reference_forward(feat2, pool_w, pool_b, w1, b1, w2, b2)
    assert out2.shape == (B2, N_CLASSES)
    assert bool(jnp.allclose(out2, ref2, atol=5e-3, rtol=5e-3))

    print("KERNEL_OK")
</pallas_src>

<mosaic_0001>
module attributes {stable_mosaic.version = 11 : i64} {
  func.func @fused_head_kernel(%arg0: i32, %arg1: memref<16x768xbf16, #tpu.memory_space<vmem>>, %arg2: memref<768x768xbf16, #tpu.memory_space<vmem>>, %arg3: memref<1x768xf32, #tpu.memory_space<vmem>>, %arg4: memref<768x256xbf16, #tpu.memory_space<vmem>>, %arg5: memref<1x256xf32, #tpu.memory_space<vmem>>, %arg6: memref<256x128xbf16, #tpu.memory_space<vmem>>, %arg7: memref<1x128xf32, #tpu.memory_space<vmem>>, %arg8: memref<16x128xf32, #tpu.memory_space<vmem>>) attributes {dimension_semantics = [#tpu.dimension_semantics<parallel>], iteration_bounds = array<i64: 1>, scalar_prefetch = 0 : i64, scratch_operands = 0 : i64, tpu.core_type = #tpu.core_type<tc>, window_params = [{transform_indices = @transform_0, window_bounds = array<i64: 16, 768>}, {pipeline_mode = #tpu.pipeline_mode<synchronous>, transform_indices = @transform_1, window_bounds = array<i64: 768, 768>}, {pipeline_mode = #tpu.pipeline_mode<synchronous>, transform_indices = @transform_2, window_bounds = array<i64: 1, 768>}, {pipeline_mode = #tpu.pipeline_mode<synchronous>, transform_indices = @transform_3, window_bounds = array<i64: 768, 256>}, {pipeline_mode = #tpu.pipeline_mode<synchronous>, transform_indices = @transform_4, window_bounds = array<i64: 1, 256>}, {pipeline_mode = #tpu.pipeline_mode<synchronous>, transform_indices = @transform_5, window_bounds = array<i64: 256, 128>}, {pipeline_mode = #tpu.pipeline_mode<synchronous>, transform_indices = @transform_6, window_bounds = array<i64: 1, 128>}, {transform_indices = @transform_7, window_bounds = array<i64: 16, 128>}]} {
    %c0 = arith.constant 0 : index
    %c0_0 = arith.constant 0 : index
    %0 = vector.load %arg1[%c0, %c0_0] : memref<16x768xbf16, #tpu.memory_space<vmem>>, vector<16x768xbf16>
    %c0_1 = arith.constant 0 : index
    %c0_2 = arith.constant 0 : index
    %1 = vector.load %arg2[%c0_1, %c0_2] : memref<768x768xbf16, #tpu.memory_space<vmem>>, vector<768x768xbf16>
    %cst = arith.constant dense<0.000000e+00> : vector<16x768xf32>
    %2 = tpu.matmul %0, %1, %cst {dimension_numbers = #tpu.dot_dimension_numbers<[1], [0], [0], [1], [0, 0, 1, 1], [], []>} : vector<16x768xbf16>, vector<768x768xbf16>, vector<16x768xf32> -> vector<16x768xf32>
    %c0_3 = arith.constant 0 : index
    %c0_4 = arith.constant 0 : index
    %3 = vector.load %arg3[%c0_3, %c0_4] : memref<1x768xf32, #tpu.memory_space<vmem>>, vector<1x768xf32>
    %4 = vector.broadcast %3 : vector<1x768xf32> to vector<16x768xf32>
    %5 = arith.addf %2, %4 : vector<16x768xf32>
    %6 = math.tanh %5 : vector<16x768xf32>
    %7 = arith.truncf %6 : vector<16x768xf32> to vector<16x768xbf16>
    %c0_5 = arith.constant 0 : index
    %c0_6 = arith.constant 0 : index
    %8 = vector.load %arg4[%c0_5, %c0_6] : memref<768x256xbf16, #tpu.memory_space<vmem>>, vector<768x256xbf16>
    %cst_7 = arith.constant dense<0.000000e+00> : vector<16x256xf32>
    %9 = tpu.matmul %7, %8, %cst_7 {dimension_numbers = #tpu.dot_dimension_numbers<[1], [0], [0], [1], [0, 0, 1, 1], [], []>} : vector<16x768xbf16>, vector<768x256xbf16>, vector<16x256xf32> -> vector<16x256xf32>
    %c0_8 = arith.constant 0 : index
    %c0_9 = arith.constant 0 : index
    %10 = vector.load %arg5[%c0_8, %c0_9] : memref<1x256xf32, #tpu.memory_space<vmem>>, vector<1x256xf32>
    %11 = vector.broadcast %10 : vector<1x256xf32> to vector<16x256xf32>
    %12 = arith.addf %9, %11 : vector<16x256xf32>
    %cst_10 = arith.constant 0.000000e+00 : f32
    %13 = vector.broadcast %cst_10 : f32 to vector<16x256xf32>
    %14 = arith.maximumf %12, %13 : vector<16x256xf32>
    %15 = arith.truncf %14 : vector<16x256xf32> to vector<16x256xbf16>
    %c0_11 = arith.constant 0 : index
    %c0_12 = arith.constant 0 : index
    %16 = vector.load %arg6[%c0_11, %c0_12] : memref<256x128xbf16, #tpu.memory_space<vmem>>, vector<256x128xbf16>
    %cst_13 = arith.constant dense<0.000000e+00> : vector<16x128xf32>
    %17 = tpu.matmul %15, %16, %cst_13 {dimension_numbers = #tpu.dot_dimension_numbers<[1], [0], [0], [1], [0, 0, 1, 1], [], []>} : vector<16x256xbf16>, vector<256x128xbf16>, vector<16x128xf32> -> vector<16x128xf32>
    %c0_14 = arith.constant 0 : index
    %c0_15 = arith.constant 0 : index
    %18 = vector.load %arg7[%c0_14, %c0_15] : memref<1x128xf32, #tpu.memory_space<vmem>>, vector<1x128xf32>
    %19 = vector.broadcast %18 : vector<1x128xf32> to vector<16x128xf32>
    %20 = arith.addf %17, %19 : vector<16x128xf32>
    %cst_16 = arith.constant dense<0xFF800000> : vector<16xf32>
    %21 = vector.multi_reduction <maximumf>, %20, %cst_16 [1] : vector<16x128xf32> to vector<16xf32>
    %22 = vector.shape_cast %21 : vector<16xf32> to vector<16x1xf32>
    %23 = vector.broadcast %22 : vector<16x1xf32> to vector<16x128xf32>
    %24 = arith.subf %20, %23 : vector<16x128xf32>
    %25 = math.exp %24 : vector<16x128xf32>
    %cst_17 = arith.constant dense<0.000000e+00> : vector<16xf32>
    %26 = vector.multi_reduction <add>, %25, %cst_17 [1] : vector<16x128xf32> to vector<16xf32>
    %27 = vector.shape_cast %26 : vector<16xf32> to vector<16x1xf32>
    %28 = tpu.reciprocal %27 {approx = true} : vector<16x1xf32> -> vector<16x1xf32>
    %29 = vector.broadcast %28 : vector<16x1xf32> to vector<16x128xf32>
    %30 = arith.mulf %25, %29 : vector<16x128xf32>
    %c0_18 = arith.constant 0 : index
    %c0_19 = arith.constant 0 : index
    %31 = vector.load %arg8[%c0_18, %c0_19] : memref<16x128xf32, #tpu.memory_space<vmem>>, vector<16x128xf32>
    tpu.vector_store %arg8[%c0_18, %c0_19], %30 {strides = array<i32>} : memref<16x128xf32, #tpu.memory_space<vmem>>, vector<16x128xf32>,
    return
  }
  func.func @transform_0(%arg0: i32) -> (i32, i32) {
    %c0_i32 = arith.constant 0 : i32
    %c0_i32_0 = arith.constant 0 : i32
    return %arg0, %c0_i32 : i32, i32
  }
  func.func @transform_1(%arg0: i32) -> (i32, i32) {
    %c0_i32 = arith.constant 0 : i32
    %c0_i32_0 = arith.constant 0 : i32
    %c0_i32_1 = arith.constant 0 : i32
    return %c0_i32, %c0_i32_0 : i32, i32
  }
  func.func @transform_2(%arg0: i32) -> (i32, i32) {
    %c0_i32 = arith.constant 0 : i32
    %c0_i32_0 = arith.constant 0 : i32
    %c0_i32_1 = arith.constant 0 : i32
    return %c0_i32, %c0_i32_0 : i32, i32
  }
  func.func @transform_3(%arg0: i32) -> (i32, i32) {
    %c0_i32 = arith.constant 0 : i32
    %c0_i32_0 = arith.constant 0 : i32
    %c0_i32_1 = arith.constant 0 : i32
    return %c0_i32, %c0_i32_0 : i32, i32
  }
  func.func @transform_4(%arg0: i32) -> (i32, i32) {
    %c0_i32 = arith.constant 0 : i32
    %c0_i32_0 = arith.constant 0 : i32
    %c0_i32_1 = arith.constant 0 : i32
    return %c0_i32, %c0_i32_0 : i32, i32
  }
  func.func @transform_5(%arg0: i32) -> (i32, i32) {
    %c0_i32 = arith.constant 0 : i32
    %c0_i32_0 = arith.constant 0 : i32
    %c0_i32_1 = arith.constant 0 : i32
    return %c0_i32, %c0_i32_0 : i32, i32
  }
  func.func @transform_6(%arg0: i32) -> (i32, i32) {
    %c0_i32 = arith.constant 0 : i32
    %c0_i32_0 = arith.constant 0 : i32
    %c0_i32_1 = arith.constant 0 : i32
    return %c0_i32, %c0_i32_0 : i32, i32
  }
  func.func @transform_7(%arg0: i32) -> (i32, i32) {
    %c0_i32 = arith.constant 0 : i32
    %c0_i32_0 = arith.constant 0 : i32
    return %arg0, %c0_i32 : i32, i32
  }
}

</mosaic_0001>

<bundles_post_ra>
// kernel: tpu_custom_call.1
= control target key start
LH: loop header
LB: loop body
LE: loop exit
PB: predicated region body
PF: predicated region fallthrough
CT: control target
= control target key end

     0   :  { %12 = vsyncpa [#allocation3], 0  ;;  %s4779_s0 = inlined_call_operand.hbm [shape: bf16[16,768], index: 0, kind: input, shape index: {}]   ;;  %s4780_s1 = inlined_call_operand.hbm [shape: bf16[768,768], index: 1, kind: input, shape index: {}]   ;;  %s4781_s2 = inlined_call_operand.hbm [shape: f32[1,768], index: 2, kind: input, shape index: {}]   ;;  %s4782_s3 = inlined_call_operand.hbm [shape: bf16[768,256], index: 3, kind: input, shape index: {}]   ;;  %s4783_s4 = inlined_call_operand.hbm [shape: f32[1,256], index: 4, kind: input, shape index: {}]   ;;  %s4784_s5 = inlined_call_operand.hbm [shape: bf16[256,128], index: 5, kind: input, shape index: {}]   ;;  %s4785_s6 = inlined_call_operand.hbm [shape: f32[1,128], index: 6, kind: input, shape index: {}]   ;;  %s4786_s7 = inlined_call_operand.hbm [shape: f32[16,128], index: 7, kind: output, shape index: {}]  }
   0x1   :  { %13 = vsyncpa [#allocation6], 0 }
   0x2   :  { %14 = vsyncpa [#allocation9], 0 }
   0x3   :  { %15 = vsyncpa [#allocation12], 0 }
   0x4   :  { %16 = vsyncpa [#allocation4], 0  ;;  %s4572_s24 = smov [#allocation5]   ;;  %s4573_s26 = smov [#allocation8]  }
   0x5   :  { %s34_s25 = sshll.u32 %s4572_s24, 4  ;;  %s56_s27 = sshll.u32 %s4573_s26, 4  ;;  %s35_s25 = int_to_ptr.vmem [resolvable:$true] %s34_s25  ;;  %s4626_s27 = int_to_ptr.vmem [resolvable:$true] %s56_s27 }
   0x6   :  { %s4386_s30 = scalar_lea.hbm %s4780_s1, 36864 }
   0x7   :  { %p4387_p0 = scmp.ne.s32.totalorder %s4780_s1, %s4386_s30  ;;  %p4390_p1 = scmp.lt.u32.totalorder %s4386_s30, %s4780_s1 }
   0x9   :  { %p4392_p2 = pnand %p4390_p1, %p4387_p0 }
   0xb   :  { %4395 = shalt.err (!%p4392_p2)
}
   0xc   :  { %s4396_s12 = scalar_lea.vmem %s35_s25, 36864  ;;  %p4401_p4 = scmp.lt.s32.totalorder %s35_s25, %s35_s25 }
   0xd   :  { %p4397_p3 = scmp.ne.s32.totalorder %s35_s25, %s4396_s12  ;;  %p4402_p5 = scmp.lt.s32.totalorder %s4396_s12, %s4396_s12 }
   0xf   :  { %p4403_p6 = por %p4402_p5, %p4401_p4 }
  0x11   :  { %p4404_p7 = pnand %p4403_p6, %p4397_p3 }
  0x13   :  { %4407 = shalt.err (!%p4404_p7)
}
  0x14   :  { %s4574_s13 = smov 384   ;;  %s4575_s14 = smov 24  }
  0x15   :  { %40 = dma.hbm_to_vmem [thread:$0]  %s4780_s1, 36864, %s35_s25, [#allocation6], %s4574_s13, %s4574_s13, %s4575_s14  }
  0x16   :  { %s4408_s19 = scalar_lea.hbm %s4782_s3, 12288 }
  0x17   :  { %p4409_p8 = scmp.ne.s32.totalorder %s4782_s3, %s4408_s19  ;;  %p4412_p9 = scmp.lt.u32.totalorder %s4408_s19, %s4782_s3 }
  0x19   :  { %p4414_p10 = pnand %p4412_p9, %p4409_p8 }
  0x1b   :  { %4417 = shalt.err (!%p4414_p10)
}
  0x1c   :  { %s4418_s24 = scalar_lea.vmem %s4626_s27, 12288  ;;  %p4423_p12 = scmp.lt.s32.totalorder %s4626_s27, %s4626_s27 }
  0x1d   :  { %p4419_p11 = scmp.ne.s32.totalorder %s4626_s27, %s4418_s24  ;;  %p4424_p13 = scmp.lt.s32.totalorder %s4418_s24, %s4418_s24 }
  0x1f   :  { %p4425_p0 = por %p4424_p13, %p4423_p12 }
  0x21   :  { %p4426_p1 = pnand %p4425_p0, %p4419_p11 }
  0x23   :  { %4429 = shalt.err (!%p4426_p1)
}
  0x24   :  { %s4576_s1 = smov 128   ;;  %s4577_s25 = smov 8  }
  0x25   :  { %62 = dma.hbm_to_vmem [thread:$0]  %s4782_s3, 12288, %s4626_s27, [#allocation9], %s4576_s1, %s4576_s1, %s4577_s25  }
  0x26   :  { %s4578_s29 = smov [#allocation11]   ;;  %s4430_s10 = scalar_lea.hbm %s4784_s5, 2048 }
  0x27   :  { %s78_s30 = sshll.u32 %s4578_s29, 4  ;;  %p4431_p2 = scmp.ne.s32.totalorder %s4784_s5, %s4430_s10  ;;  %s79_s30 = int_to_ptr.vmem [resolvable:$true] %s78_s30 }
  0x28   :  { %p4434_p3 = scmp.lt.u32.totalorder %s4430_s10, %s4784_s5 }
  0x2a   :  { %p4436_p4 = pnand %p4434_p3, %p4431_p2 }
  0x2c   :  { %4439 = shalt.err (!%p4436_p4)
}
  0x2d   :  { %s4440_s17 = scalar_lea.vmem %s79_s30, 2048  ;;  %p4445_p6 = scmp.lt.s32.totalorder %s79_s30, %s79_s30 }
  0x2e   :  { %p4441_p5 = scmp.ne.s32.totalorder %s79_s30, %s4440_s17  ;;  %p4446_p7 = scmp.lt.s32.totalorder %s4440_s17, %s4440_s17 }
  0x30   :  { %p4447_p8 = por %p4446_p7, %p4445_p6 }
  0x32   :  { %p4448_p9 = pnand %p4447_p8, %p4441_p5 }
  0x34   :  { %4451 = shalt.err (!%p4448_p9)
}
  0x35   :  { %s4579_s3 = smov 64   ;;  %s4580_s27 = smov 4  }
  0x36   :  { %84 = dma.hbm_to_vmem [thread:$0]  %s4784_s5, 2048, %s79_s30, [#allocation12], %s4579_s3, %s4579_s3, %s4580_s27  }
  0x37   :  { %s4581_s20 = smov [#allocation2]   ;;  %s4582_s22 = smov [#allocation7]  }
  0x38   :  { %s22_s21 = sshll.u32 %s4581_s20, 4  ;;  %s47_s23 = sshll.u32 %s4582_s22, 4  ;;  %s23_s21 = int_to_ptr.vmem [resolvable:$true] %s22_s21  ;;  %s48_s23 = int_to_ptr.vmem [resolvable:$true] %s47_s23 }
  0x39   :  { %s4452_s28 = scalar_lea.hbm %s4779_s0, 768 }
  0x3a   :  { %p4453_p10 = scmp.ne.s32.totalorder %s4779_s0, %s4452_s28  ;;  %p4456_p11 = scmp.lt.u32.totalorder %s4452_s28, %s4779_s0 }
  0x3c   :  { %p4458_p12 = pnand %p4456_p11, %p4453_p10 }
  0x3e   :  { %4461 = shalt.err (!%p4458_p12)
}
  0x3f   :  { %s4462_s5 = scalar_lea.vmem %s23_s21, 768  ;;  %p4467_p0 = scmp.lt.s32.totalorder %s23_s21, %s23_s21 }
  0x40   :  { %p4463_p13 = scmp.ne.s32.totalorder %s23_s21, %s4462_s5  ;;  %p4468_p1 = scmp.lt.s32.totalorder %s4462_s5, %s4462_s5 }
  0x42   :  { %p4469_p2 = por %p4468_p1, %p4467_p0 }
  0x44   :  { %p4470_p3 = pnand %p4469_p2, %p4463_p13 }
  0x46   :  { %4473 = shalt.err (!%p4470_p3)
}
  0x47   :  { %28 = dma.hbm_to_vmem [thread:$0]  %s4779_s0, 768, %s23_s21, [#allocation3], %s4574_s13, %s4574_s13, %s4575_s14  }
  0x48   :  { %s4474_s16 = scalar_lea.hbm %s4781_s2, 96 }
  0x49   :  { %p4475_p4 = scmp.ne.s32.totalorder %s4781_s2, %s4474_s16  ;;  %p4478_p5 = scmp.lt.u32.totalorder %s4474_s16, %s4781_s2 }
  0x4b   :  { %p4480_p6 = pnand %p4478_p5, %p4475_p4 }
  0x4d   :  { %4483 = shalt.err (!%p4480_p6)
}
  0x4e   :  { %s4484_s19 = scalar_lea.vmem %s48_s23, 96  ;;  %p4489_p8 = scmp.lt.s32.totalorder %s48_s23, %s48_s23 }
  0x4f   :  { %p4485_p7 = scmp.ne.s32.totalorder %s48_s23, %s4484_s19  ;;  %p4490_p9 = scmp.lt.s32.totalorder %s4484_s19, %s4484_s19 }
  0x51   :  { %p4491_p10 = por %p4490_p9, %p4489_p8 }
  0x53   :  { %p4492_p11 = pnand %p4491_p10, %p4485_p7 }
  0x55   :  { %4495 = shalt.err (!%p4492_p11)
}
  0x56   :  { %50 = dma.hbm_to_vmem [thread:$0]  %s4781_s2, 96, %s48_s23, [#allocation6]  }
  0x57   :  { %s4583_s14 = smov [#allocation10]   ;;  %s4584_s21 = smov [#allocation13]  }
  0x58   :  { %s69_s20 = sshll.u32 %s4583_s14, 4  ;;  %s91_s22 = sshll.u32 %s4584_s21, 4  ;;  %s70_s20 = int_to_ptr.vmem [resolvable:$true] %s69_s20  ;;  %s92_s22 = int_to_ptr.vmem [resolvable:$true] %s91_s22 }
  0x59   :  { %s4496_s28 = scalar_lea.hbm %s4783_s4, 32 }
  0x5a   :  { %p4497_p12 = scmp.ne.s32.totalorder %s4783_s4, %s4496_s28  ;;  %p4500_p13 = scmp.lt.u32.totalorder %s4496_s28, %s4783_s4 }
  0x5c   :  { %p4502_p0 = pnand %p4500_p13, %p4497_p12 }
  0x5e   :  { %4505 = shalt.err (!%p4502_p0)
}
  0x5f   :  { %s4506_s2 = scalar_lea.vmem %s70_s20, 32  ;;  %p4511_p2 = scmp.lt.s32.totalorder %s70_s20, %s70_s20 }
  0x60   :  { %p4507_p1 = scmp.ne.s32.totalorder %s70_s20, %s4506_s2  ;;  %p4512_p3 = scmp.lt.s32.totalorder %s4506_s2, %s4506_s2 }
  0x62   :  { %p4513_p4 = por %p4512_p3, %p4511_p2 }
  0x64   :  { %p4514_p5 = pnand %p4513_p4, %p4507_p1 }
  0x66   :  { %4517 = shalt.err (!%p4514_p5)
}
  0x67   :  { %72 = dma.hbm_to_vmem [thread:$0]  %s4783_s4, 32, %s70_s20, [#allocation9]  }
  0x68   :  { %s4518_s12 = scalar_lea.hbm %s4785_s6, 16 }
  0x69   :  { %p4519_p6 = scmp.ne.s32.totalorder %s4785_s6, %s4518_s12  ;;  %p4522_p7 = scmp.lt.u32.totalorder %s4518_s12, %s4785_s6 }
  0x6b   :  { %p4524_p8 = pnand %p4522_p7, %p4519_p6 }
  0x6d   :  { %4527 = shalt.err (!%p4524_p8)
}
  0x6e   :  { %s4528_s27 = scalar_lea.vmem %s92_s22, 16  ;;  %s4532_s18 = scalar_lea.vmem %s92_s22, 32 }
  0x6f   :  { %p4529_p9 = scmp.ne.s32.totalorder %s92_s22, %s4528_s27  ;;  %p4533_p10 = scmp.lt.s32.totalorder %s92_s22, %s92_s22 }
  0x70   :  { %p4534_p11 = scmp.lt.s32.totalorder %s4532_s18, %s4528_s27 }
  0x72   :  { %p4535_p12 = por %p4534_p11, %p4533_p10 }
  0x74   :  { %p4536_p13 = pnand %p4535_p12, %p4529_p9 }
  0x76   :  { %4539 = shalt.err (!%p4536_p13)
}
  0x77   :  { %94 = dma.hbm_to_vmem [thread:$0]  %s4785_s6, 16, %s92_s22, [#allocation12]  }
  0x78   :  { %4562 = dma.done.wait [#allocation3], 768  }
  0x79   :  { %4563 = vsyncadd [#allocation3], 4294966528 }
  0x7a   :  { %4564 = dma.done.wait [#allocation6], 36960  }
  0x7b   :  { %4565 = vsyncadd [#allocation6], 4294930336 }
  0x7c   :  { %4566 = dma.done.wait [#allocation9], 12320  }
  0x7d   :  { %4567 = vsyncadd [#allocation9], 4294954976 }
  0x7e   :  { %4568 = dma.done.wait [#allocation12], 2064  }
  0x7f   :  { %4569 = vsyncadd [#allocation12], 4294965232  ;;  %v3748_v0 = vld [vmem:[#allocation5 + $0x4] ss:$24 sps:$4 sm:$0xff]   ;;  %v3752_v2 = vld [vmem:[#allocation5] ss:$24 sps:$4 sm:$0xff]  }
  0x80   :  { %v3750_v1 = vld [vmem:[#allocation5 + $0xc] ss:$24 sps:$4 sm:$0xff]   ;;  %1913 = vmatprep.subr.bf16.mxu0 %v3748_v0  ;;  %v3753_v3 = vld [vmem:[#allocation5 + $0x8] ss:$24 sps:$4 sm:$0xff]   ;;  %v3756_v5 = vld [vmem:[#allocation5 + $0x3c] ss:$24 sps:$4 sm:$0xff]  }
  0x81   :  { %2042 = vmatprep.subr.bf16.mxu1 %v3750_v1  ;;  %v3754_v4 = vld [vmem:[#allocation5 + $0x34] ss:$24 sps:$4 sm:$0xff]   ;;  %1914 = vmatpush1.bf16.msra.mxu0 %v3752_v2  ;;  %v3758_v6 = vld [vmem:[#allocation5 + $0x30] ss:$24 sps:$4 sm:$0xff]   ;;  %v3760_v8 = vld [vmem:[#allocation5 + $0x64] ss:$24 sps:$4 sm:$0xff]  }
  0x82   :  { %2043 = vmatpush1.bf16.msra.mxu1 %v3753_v3  ;;  %1915 = vmatprep.subr.bf16.mxu0 %v3754_v4  ;;  %v3759_v7 = vld [vmem:[#allocation5 + $0x38] ss:$24 sps:$4 sm:$0xff]   ;;  %v3762_v9 = vld [vmem:[#allocation5 + $0x6c] ss:$24 sps:$4 sm:$0xff]   ;;  %v3765_v11 = vld [vmem:[#allocation5 + $0x68] ss:$24 sps:$4 sm:$0xff]  }
  0x83   :  { %2044 = vmatprep.subr.bf16.mxu1 %v3756_v5  ;;  %v3764_v10 = vld [vmem:[#allocation5 + $0x60] ss:$24 sps:$4 sm:$0xff]   ;;  %v3766_v12 = vld [vmem:[#allocation5 + $0x94] ss:$24 sps:$4 sm:$0xff]   ;;  %v3770_v14 = vld [vmem:[#allocation5 + $0x90] ss:$24 sps:$4 sm:$0xff]  }
  0x84   :  { %v3768_v13 = vld [vmem:[#allocation5 + $0x9c] ss:$24 sps:$4 sm:$0xff]   ;;  %v3771_v15 = vld [vmem:[#allocation5 + $0x98] ss:$24 sps:$4 sm:$0xff]   ;;  %v3774_v17 = vld [vmem:[#allocation5 + $0xcc] ss:$24 sps:$4 sm:$0xff]  }
  0x85   :  { %1916 = vmatpush1.bf16.msra.mxu0 %v3758_v6  ;;  %v3772_v16 = vld [vmem:[#allocation5 + $0xc4] ss:$24 sps:$4 sm:$0xff]   ;;  %v3776_v18 = vld [vmem:[#allocation5 + $0xc0] ss:$24 sps:$4 sm:$0xff]   ;;  %v3778_v20 = vld [vmem:[#allocation5 + $0xf4] ss:$24 sps:$4 sm:$0xff]  }
  0x86   :  { %2045 = vmatpush1.bf16.msra.mxu1 %v3759_v7  ;;  %1917 = vmatprep.subr.bf16.mxu0 %v3760_v8  ;;  %v3777_v19 = vld [vmem:[#allocation5 + $0xc8] ss:$24 sps:$4 sm:$0xff]   ;;  %v3780_v21 = vld [vmem:[#allocation5 + $0xfc] ss:$24 sps:$4 sm:$0xff]   ;;  %v3783_v23 = vld [vmem:[#allocation5 + $0xf8] ss:$24 sps:$4 sm:$0xff]  }
  0x87   :  { %2046 = vmatprep.subr.bf16.mxu1 %v3762_v9  ;;  %v3782_v22 = vld [vmem:[#allocation5 + $0xf0] ss:$24 sps:$4 sm:$0xff]   ;;  %v3784_v24 = vld [vmem:[#allocation5 + $0x124] ss:$24 sps:$4 sm:$0xff]   ;;  %v3788_v26 = vld [vmem:[#allocation5 + $0x120] ss:$24 sps:$4 sm:$0xff]  }
  0x88   :  { %v3786_v25 = vld [vmem:[#allocation5 + $0x12c] ss:$24 sps:$4 sm:$0xff]   ;;  %v3789_v27 = vld [vmem:[#allocation5 + $0x128] ss:$24 sps:$4 sm:$0xff]   ;;  %v3792_v29 = vld [vmem:[#allocation5 + $0x15c] ss:$24 sps:$4 sm:$0xff]  }
  0x89   :  { %1918 = vmatpush1.bf16.msra.mxu0 %v3764_v10  ;;  %v3790_v28 = vld [vmem:[#allocation5 + $0x154] ss:$24 sps:$4 sm:$0xff]   ;;  %v3794_v30 = vld [vmem:[#allocation5 + $0x150] ss:$24 sps:$4 sm:$0xff]   ;;  %v3796_v32 = vld [vmem:[#allocation5 + $0x184] ss:$24 sps:$4 sm:$0xff]  }
  0x8a   :  { %2047 = vmatpush1.bf16.msra.mxu1 %v3765_v11  ;;  %1919 = vmatprep.subr.bf16.mxu0 %v3766_v12  ;;  %v3795_v31 = vld [vmem:[#allocation5 + $0x158] ss:$24 sps:$4 sm:$0xff]   ;;  %v3798_v33 = vld [vmem:[#allocation5 + $0x18c] ss:$24 sps:$4 sm:$0xff]   ;;  %v3801_v35 = vld [vmem:[#allocation5 + $0x188] ss:$24 sps:$4 sm:$0xff]  }
  0x8b   :  { %2048 = vmatprep.subr.bf16.mxu1 %v3768_v13  ;;  %v3800_v34 = vld [vmem:[#allocation5 + $0x180] ss:$24 sps:$4 sm:$0xff]   ;;  %v3802_v36 = vld [vmem:[#allocation5 + $0x1b4] ss:$24 sps:$4 sm:$0xff]   ;;  %v3806_v38 = vld [vmem:[#allocation5 + $0x1b0] ss:$24 sps:$4 sm:$0xff]  }
  0x8c   :  { %v3804_v37 = vld [vmem:[#allocation5 + $0x1bc] ss:$24 sps:$4 sm:$0xff]   ;;  %v3807_v39 = vld [vmem:[#allocation5 + $0x1b8] ss:$24 sps:$4 sm:$0xff]   ;;  %v3810_v41 = vld [vmem:[#allocation5 + $0x1ec] ss:$24 sps:$4 sm:$0xff]  }
  0x8d   :  { %1920 = vmatpush1.bf16.msra.mxu0 %v3770_v14  ;;  %v3808_v40 = vld [vmem:[#allocation5 + $0x1e4] ss:$24 sps:$4 sm:$0xff]   ;;  %v3812_v42 = vld [vmem:[#allocation5 + $0x1e0] ss:$24 sps:$4 sm:$0xff]   ;;  %v3814_v44 = vld [vmem:[#allocation5 + $0x214] ss:$24 sps:$4 sm:$0xff]  }
  0x8e   :  { %2049 = vmatpush1.bf16.msra.mxu1 %v3771_v15  ;;  %1921 = vmatprep.subr.bf16.mxu0 %v3772_v16  ;;  %v3813_v43 = vld [vmem:[#allocation5 + $0x1e8] ss:$24 sps:$4 sm:$0xff]   ;;  %v3816_v45 = vld [vmem:[#allocation5 + $0x21c] ss:$24 sps:$4 sm:$0xff]   ;;  %v3819_v48 = vld [vmem:[#allocation5 + $0x218] ss:$24 sps:$4 sm:$0xff]  }
  0x8f   :  { %2050 = vmatprep.subr.bf16.mxu1 %v3774_v17  ;;  %v3818_v46 = vld [vmem:[#allocation5 + $0x210] ss:$24 sps:$4 sm:$0xff]   ;;  %v3844_v47 = vld [vmem:[#allocation2 + $0x4] ss:$24 sps:$4 sm:$0xff]   ;;  %v3820_v49 = vld [vmem:[#allocation5 + $0x244] ss:$24 sps:$4 sm:$0xff]  }
  0x90   :  { %v3822_v50 = vld [vmem:[#allocation5 + $0x24c] ss:$24 sps:$4 sm:$0xff]   ;;  %1945 = vmatprep.mubr.bf16.mxu0 %v3844_v47  ;;  %2074 = vmatprep.mubr.bf16.mxu1 %v3844_v47  ;;  %v3824_v51 = vld [vmem:[#allocation5 + $0x240] ss:$24 sps:$4 sm:$0xff]   ;;  %v3828_v54 = vld [vmem:[#allocation5 + $0x27c] ss:$24 sps:$4 sm:$0xff]  }
  0x91   :  { %1922 = vmatpush1.bf16.msra.mxu0 %v3776_v18  ;;  %v3825_v52 = vld [vmem:[#allocation5 + $0x248] ss:$24 sps:$4 sm:$0xff]   ;;  %v3826_v53 = vld [vmem:[#allocation5 + $0x274] ss:$24 sps:$4 sm:$0xff]   ;;  %v3831_v56 = vld [vmem:[#allocation5 + $0x278] ss:$24 sps:$4 sm:$0xff]  }
  0x92   :  { %2051 = vmatpush1.bf16.msra.mxu1 %v3777_v19  ;;  %1923 = vmatprep.subr.bf16.mxu0 %v3778_v20  ;;  %v3830_v55 = vld [vmem:[#allocation5 + $0x270] ss:$24 sps:$4 sm:$0xff]   ;;  %v3832_v57 = vld [vmem:[#allocation5 + $0x2a4] ss:$24 sps:$4 sm:$0xff]   ;;  %v3836_v59 = vld [vmem:[#allocation5 + $0x2a0] ss:$24 sps:$4 sm:$0xff]  }
  0x93   :  { %2052 = vmatprep.subr.bf16.mxu1 %v3780_v21  ;;  %v3834_v58 = vld [vmem:[#allocation5 + $0x2ac] ss:$24 sps:$4 sm:$0xff]   ;;  %v3837_v60 = vld [vmem:[#allocation5 + $0x2a8] ss:$24 sps:$4 sm:$0xff]   ;;  %v3840_v62 = vld [vmem:[#allocation5 + $0x2dc] ss:$24 sps:$4 sm:$0xff]  }
  0x94   :  { %v3838_v61 = vld [vmem:[#allocation5 + $0x2d4] ss:$24 sps:$4 sm:$0xff]   ;;  %v3842_v63 = vld [vmem:[#allocation5 + $0x2d0] ss:$24 sps:$4 sm:$0xff]   ;;  %v3848_v1 = vld [vmem:[#allocation5 + $0x304] ss:$24 sps:$4 sm:$0xff]  }
  0x95   :  { %1924 = vmatpush1.bf16.msra.mxu0 %v3782_v22  ;;  %v3843_v0 = vld [vmem:[#allocation5 + $0x2d8] ss:$24 sps:$4 sm:$0xff]   ;;  %v3851_v2 = vld [vmem:[#allocation5 + $0x30c] ss:$24 sps:$4 sm:$0xff]   ;;  %v3849_v4 = vld [vmem:[#allocation5 + $0x308] ss:$24 sps:$4 sm:$0xff]  }
  0x96   :  { %2053 = vmatpush1.bf16.msra.mxu1 %v3783_v23  ;;  %1925 = vmatprep.subr.bf16.mxu0 %v3784_v24  ;;  %v3846_v3 = vld [vmem:[#allocation5 + $0x300] ss:$24 sps:$4 sm:$0xff]   ;;  %v3852_v5 = vld [vmem:[#allocation2] ss:$24 sps:$4 sm:$0xff]   ;;  %v3855_v6 = vld [vmem:[#allocation5 + $0x334] ss:$24 sps:$4 sm:$0xff]  }
  0x97   :  { %2054 = vmatprep.subr.bf16.mxu1 %v3786_v25  ;;  %v3858_v7 = vld [vmem:[#allocation5 + $0x33c] ss:$24 sps:$4 sm:$0xff]   ;;  %v3853_v8 = vld [vmem:[#allocation5 + $0x330] ss:$24 sps:$4 sm:$0xff]   ;;  %v3864_v11 = vld [vmem:[#allocation5 + $0x36c] ss:$24 sps:$4 sm:$0xff]  }
  0x98   :  { %v3856_v9 = vld [vmem:[#allocation5 + $0x338] ss:$24 sps:$4 sm:$0xff]   ;;  %v3861_v10 = vld [vmem:[#allocation5 + $0x364] ss:$24 sps:$4 sm:$0xff]   ;;  %v3862_v13 = vld [vmem:[#allocation5 + $0x368] ss:$24 sps:$4 sm:$0xff]  }
  0x99   :  { %1926 = vmatpush1.bf16.msra.mxu0 %v3788_v26  ;;  %v3859_v12 = vld [vmem:[#allocation5 + $0x360] ss:$24 sps:$4 sm:$0xff]   ;;  %v3867_v14 = vld [vmem:[#allocation5 + $0x394] ss:$24 sps:$4 sm:$0xff]   ;;  %v3865_v16 = vld [vmem:[#allocation5 + $0x390] ss:$24 sps:$4 sm:$0xff]  }
  0x9a   :  { %2055 = vmatpush1.bf16.msra.mxu1 %v3789_v27  ;;  %1927 = vmatprep.subr.bf16.mxu0 %v3790_v28  ;;  %v3870_v15 = vld [vmem:[#allocation5 + $0x39c] ss:$24 sps:$4 sm:$0xff]   ;;  %v3868_v17 = vld [vmem:[#allocation5 + $0x398] ss:$24 sps:$4 sm:$0xff]   ;;  %v3876_v19 = vld [vmem:[#allocation5 + $0x3cc] ss:$24 sps:$4 sm:$0xff]  }
  0x9b   :  { %2056 = vmatprep.subr.bf16.mxu1 %v3792_v29  ;;  %v3873_v18 = vld [vmem:[#allocation5 + $0x3c4] ss:$24 sps:$4 sm:$0xff]   ;;  %v3871_v20 = vld [vmem:[#allocation5 + $0x3c0] ss:$24 sps:$4 sm:$0xff]   ;;  %v3879_v22 = vld [vmem:[#allocation5 + $0x3f4] ss:$24 sps:$4 sm:$0xff]  }
  0x9c   :  { %v3874_v21 = vld [vmem:[#allocation5 + $0x3c8] ss:$24 sps:$4 sm:$0xff]   ;;  %v3882_v23 = vld [vmem:[#allocation5 + $0x3fc] ss:$24 sps:$4 sm:$0xff]   ;;  %v3880_v25 = vld [vmem:[#allocation5 + $0x3f8] ss:$24 sps:$4 sm:$0xff]  }
  0x9d   :  { %1928 = vmatpush1.bf16.msra.mxu0 %v3794_v30  ;;  %v3877_v24 = vld [vmem:[#allocation5 + $0x3f0] ss:$24 sps:$4 sm:$0xff]   ;;  %v3885_v26 = vld [vmem:[#allocation5 + $0x424] ss:$24 sps:$4 sm:$0xff]   ;;  %v3883_v28 = vld [vmem:[#allocation5 + $0x420] ss:$24 sps:$4 sm:$0xff]  }
  0x9e   :  { %2057 = vmatpush1.bf16.msra.mxu1 %v3795_v31  ;;  %1929 = vmatprep.subr.bf16.mxu0 %v3796_v32  ;;  %v3888_v27 = vld [vmem:[#allocation5 + $0x42c] ss:$24 sps:$4 sm:$0xff]   ;;  %v3886_v29 = vld [vmem:[#allocation5 + $0x428] ss:$24 sps:$4 sm:$0xff]   ;;  %v3945_v30 = vld [vmem:[#allocation2 + $0xc] ss:$24 sps:$4 sm:$0xff]  }
  0x9f   :  { %2058 = vmatprep.subr.bf16.mxu1 %v3798_v33  ;;  %v3891_v31 = vld [vmem:[#allocation5 + $0x454] ss:$24 sps:$4 sm:$0xff]   ;;  %v3889_v33 = vld [vmem:[#allocation5 + $0x450] ss:$24 sps:$4 sm:$0xff]   ;;  %s4585_s6 = smov [#allocation14]  }
  0xa0   :  { %v3894_v32 = vld [vmem:[#allocation5 + $0x45c] ss:$24 sps:$4 sm:$0xff]   ;;  %s3242_s0 = sshll.u32 %s4585_s6, 4  ;;  %s3243_s0 = int_to_ptr.vmem [resolvable:$true] %s3242_s0 }
  0xa1   :  { %1930 = vmatpush1.bf16.msra.mxu0 %v3800_v34  ;;  %v3892_v34 = vld [vmem:[#allocation5 + $0x458] ss:$24 sps:$4 sm:$0xff]   ;;  %v3915_v47 = vld [vmem:[#allocation5 + $0x514] ss:$24 sps:$4 sm:$0xff]   ;;  %s4540_s13 = scalar_lea.vmem %s3243_s0, 256  ;;  %p4545_p1 = scmp.lt.s32.totalorder %s3243_s0, %s3243_s0 }
  0xa2   :  { %2059 = vmatpush1.bf16.msra.mxu1 %v3801_v35  ;;  %1931 = vmatprep.subr.bf16.mxu0 %v3802_v36  ;;  %v3897_v35 = vld [vmem:[#allocation5 + $0x484] ss:$24 sps:$4 sm:$0xff]   ;;  %p4541_p0 = scmp.ne.s32.totalorder %s3243_s0, %s4540_s13  ;;  %p4546_p2 = scmp.lt.s32.totalorder %s4540_s13, %s4540_s13 }
  0xa3   :  { %2060 = vmatprep.subr.bf16.mxu1 %v3804_v37  ;;  %v3900_v36 = vld [vmem:[#allocation5 + $0x48c] ss:$24 sps:$4 sm:$0xff]   ;;  %v3895_v37 = vld [vmem:[#allocation5 + $0x480] ss:$24 sps:$4 sm:$0xff]  }
  0xa4   :  { %p4547_p3 = por %p4546_p2, %p4545_p1 }
  0xa5   :  { %1932 = vmatpush1.bf16.msra.mxu0 %v3806_v38  ;;  %v3898_v38 = vld [vmem:[#allocation5 + $0x488] ss:$24 sps:$4 sm:$0xff]  }
  0xa6   :  { %2061 = vmatpush1.bf16.msra.mxu1 %v3807_v39  ;;  %1933 = vmatprep.subr.bf16.mxu0 %v3808_v40  ;;  %v3903_v39 = vld [vmem:[#allocation5 + $0x4b4] ss:$24 sps:$4 sm:$0xff]   ;;  %p4548_p4 = pnand %p4547_p3, %p4541_p0 }
  0xa7   :  { %2062 = vmatprep.subr.bf16.mxu1 %v3810_v41  ;;  %v3906_v40 = vld [vmem:[#allocation5 + $0x4bc] ss:$24 sps:$4 sm:$0xff]   ;;  %v3901_v41 = vld [vmem:[#allocation5 + $0x4b0] ss:$24 sps:$4 sm:$0xff]  }
  0xa9   :  { %1934 = vmatpush1.bf16.msra.mxu0 %v3812_v42  ;;  %v3904_v42 = vld [vmem:[#allocation5 + $0x4b8] ss:$24 sps:$4 sm:$0xff]  }
  0xaa   :  { %2063 = vmatpush1.bf16.msra.mxu1 %v3813_v43  ;;  %1935 = vmatprep.subr.bf16.mxu0 %v3814_v44  ;;  %v3909_v43 = vld [vmem:[#allocation5 + $0x4e4] ss:$24 sps:$4 sm:$0xff]  }
  0xab   :  { %2064 = vmatprep.subr.bf16.mxu1 %v3816_v45  ;;  %v3912_v44 = vld [vmem:[#allocation5 + $0x4ec] ss:$24 sps:$4 sm:$0xff]   ;;  %v3907_v45 = vld [vmem:[#allocation5 + $0x4e0] ss:$24 sps:$4 sm:$0xff]  }
  0xad   :  { %1936 = vmatpush1.bf16.msra.mxu0 %v3818_v46  ;;  %v3910_v46 = vld [vmem:[#allocation5 + $0x4e8] ss:$24 sps:$4 sm:$0xff]  }
  0xae   :  { %2065 = vmatpush1.bf16.msra.mxu1 %v3819_v48  ;;  %1937 = vmatprep.subr.bf16.mxu0 %v3820_v49  ;;  %v3918_v48 = vld [vmem:[#allocation5 + $0x51c] ss:$24 sps:$4 sm:$0xff]   ;;  %v3913_v49 = vld [vmem:[#allocation5 + $0x510] ss:$24 sps:$4 sm:$0xff]  }
  0xaf   :  { %2066 = vmatprep.subr.bf16.mxu1 %v3822_v50  ;;  %v3916_v50 = vld [vmem:[#allocation5 + $0x518] ss:$24 sps:$4 sm:$0xff]  }
  0xb1   :  { %1938 = vmatpush1.bf16.msra.mxu0 %v3824_v51  ;;  %v3921_v51 = vld [vmem:[#allocation5 + $0x544] ss:$24 sps:$4 sm:$0xff]  }
  0xb2   :  { %2067 = vmatpush1.bf16.msra.mxu1 %v3825_v52  ;;  %1939 = vmatprep.subr.bf16.mxu0 %v3826_v53  ;;  %v3924_v52 = vld [vmem:[#allocation5 + $0x54c] ss:$24 sps:$4 sm:$0xff]   ;;  %v3919_v53 = vld [vmem:[#allocation5 + $0x540] ss:$24 sps:$4 sm:$0xff]  }
  0xb3   :  { %2068 = vmatprep.subr.bf16.mxu1 %v3828_v54  ;;  %v3922_v54 = vld [vmem:[#allocation5 + $0x548] ss:$24 sps:$4 sm:$0xff]  }
  0xb5   :  { %1940 = vmatpush1.bf16.msra.mxu0 %v3830_v55  ;;  %v3927_v55 = vld [vmem:[#allocation5 + $0x574] ss:$24 sps:$4 sm:$0xff]  }
  0xb6   :  { %2069 = vmatpush1.bf16.msra.mxu1 %v3831_v56  ;;  %1941 = vmatprep.subr.bf16.mxu0 %v3832_v57  ;;  %v3930_v56 = vld [vmem:[#allocation5 + $0x57c] ss:$24 sps:$4 sm:$0xff]   ;;  %v3925_v57 = vld [vmem:[#allocation5 + $0x570] ss:$24 sps:$4 sm:$0xff]  }
  0xb7   :  { %2070 = vmatprep.subr.bf16.mxu1 %v3834_v58  ;;  %v3928_v58 = vld [vmem:[#allocation5 + $0x578] ss:$24 sps:$4 sm:$0xff]  }
  0xb9   :  { %1942 = vmatpush1.bf16.msra.mxu0 %v3836_v59  ;;  %v3933_v59 = vld [vmem:[#allocation5 + $0x5a4] ss:$24 sps:$4 sm:$0xff]  }
  0xba   :  { %2071 = vmatpush1.bf16.msra.mxu1 %v3837_v60  ;;  %1943 = vmatprep.subr.bf16.mxu0 %v3838_v61  ;;  %v3936_v60 = vld [vmem:[#allocation5 + $0x5ac] ss:$24 sps:$4 sm:$0xff]   ;;  %v3931_v61 = vld [vmem:[#allocation5 + $0x5a0] ss:$24 sps:$4 sm:$0xff]  }
  0xbb   :  { %2072 = vmatprep.subr.bf16.mxu1 %v3840_v62  ;;  %v3934_v62 = vld [vmem:[#allocation5 + $0x5a8] ss:$24 sps:$4 sm:$0xff]  }
  0xbd   :  { %1944 = vmatpush1.bf16.msra.mxu0 %v3842_v63  ;;  %v3939_v63 = vld [vmem:[#allocation5 + $0x5d4] ss:$24 sps:$4 sm:$0xff]  }
  0xbe   :  { %2073 = vmatpush1.bf16.msra.mxu1 %v3843_v0  ;;  %1956 = vmatprep.subr.bf16.mxu0 %v3848_v1  ;;  %v3942_v0 = vld [vmem:[#allocation5 + $0x5dc] ss:$24 sps:$4 sm:$0xff]   ;;  %v3937_v1 = vld [vmem:[#allocation5 + $0x5d0] ss:$24 sps:$4 sm:$0xff]  }
  0xbf   :  { %2085 = vmatprep.subr.bf16.mxu1 %v3851_v2  ;;  %v3940_v2 = vld [vmem:[#allocation5 + $0x5d8] ss:$24 sps:$4 sm:$0xff]  }
  0xc0   :  { %1946 = vmatmul.mubr.bf16.vlgmr.msra.gmra.mrb[0].mxu0 %v3852_v5 }
  0xc1   :  { %2075 = vmatmul.mubr.bf16.vlgmr.msra.gmra.mrb[0].mxu1 %v3852_v5  ;;  %1957 = vmatpush1.bf16.msra.mxu0 %v3846_v3  ;;  %v3948_v3 = vld [vmem:[#allocation5 + $0x604] ss:$24 sps:$4 sm:$0xff]   ;;  %v3943_v5 = vld [vmem:[#allocation2 + $0x8] ss:$24 sps:$4 sm:$0xff]  }
  0xc2   :  { %2086 = vmatpush1.bf16.msra.mxu1 %v3849_v4  ;;  %1958 = vmatprep.subr.bf16.mxu0 %v3855_v6  ;;  %v3951_v4 = vld [vmem:[#allocation5 + $0x60c] ss:$24 sps:$4 sm:$0xff]   ;;  %v3946_v6 = vld [vmem:[#allocation5 + $0x600] ss:$24 sps:$4 sm:$0xff]  }
  0xc3   :  { %2087 = vmatprep.subr.bf16.mxu1 %v3858_v7  ;;  %1988 = vmatprep.mubr.bf16.mxu0 %v3945_v30  ;;  %v3949_v7 = vld [vmem:[#allocation5 + $0x608] ss:$24 sps:$4 sm:$0xff]  }
  0xc4   :  { %2117 = vmatprep.mubr.bf16.mxu1 %v3945_v30  ;;  %v3987_v30 = vld [vmem:[#allocation5 + $0x72c] ss:$24 sps:$4 sm:$0xff]  }
  0xc5   :  { %1959 = vmatpush1.bf16.msra.mxu0 %v3853_v8  ;;  %v3954_v8 = vld [vmem:[#allocation5 + $0x634] ss:$24 sps:$4 sm:$0xff]  }
  0xc6   :  { %2088 = vmatpush1.bf16.msra.mxu1 %v3856_v9  ;;  %1960 = vmatprep.subr.bf16.mxu0 %v3861_v10  ;;  %v3957_v9 = vld [vmem:[#allocation5 + $0x63c] ss:$24 sps:$4 sm:$0xff]   ;;  %v3952_v10 = vld [vmem:[#allocation5 + $0x630] ss:$24 sps:$4 sm:$0xff]  }
  0xc7   :  { %2089 = vmatprep.subr.bf16.mxu1 %v3864_v11  ;;  %v3955_v11 = vld [vmem:[#allocation5 + $0x638] ss:$24 sps:$4 sm:$0xff]  }
  0xc9   :  { %1961 = vmatpush1.bf16.msra.mxu0 %v3859_v12  ;;  %v4044_v12 = vld [vmem:[#allocation2 + $0x14] ss:$24 sps:$4 sm:$0xff]  }
  0xca   :  { %2090 = vmatpush1.bf16.msra.mxu1 %v3862_v13  ;;  %1962 = vmatprep.subr.bf16.mxu0 %v3867_v14  ;;  %v3960_v13 = vld [vmem:[#allocation5 + $0x664] ss:$24 sps:$4 sm:$0xff]  }
  0xcb   :  { %2091 = vmatprep.subr.bf16.mxu1 %v3870_v15  ;;  %v3963_v14 = vld [vmem:[#allocation5 + $0x66c] ss:$24 sps:$4 sm:$0xff]   ;;  %v3958_v15 = vld [vmem:[#allocation5 + $0x660] ss:$24 sps:$4 sm:$0xff]  }
  0xcd   :  { %1963 = vmatpush1.bf16.msra.mxu0 %v3865_v16  ;;  %v3961_v16 = vld [vmem:[#allocation5 + $0x668] ss:$24 sps:$4 sm:$0xff]  }
  0xce   :  { %2092 = vmatpush1.bf16.msra.mxu1 %v3868_v17  ;;  %1964 = vmatprep.subr.bf16.mxu0 %v3873_v18  ;;  %v3966_v17 = vld [vmem:[#allocation5 + $0x694] ss:$24 sps:$4 sm:$0xff]  }
  0xcf   :  { %2093 = vmatprep.subr.bf16.mxu1 %v3876_v19  ;;  %v3969_v18 = vld [vmem:[#allocation5 + $0x69c] ss:$24 sps:$4 sm:$0xff]   ;;  %v3964_v19 = vld [vmem:[#allocation5 + $0x690] ss:$24 sps:$4 sm:$0xff]  }
  0xd1   :  { %1965 = vmatpush1.bf16.msra.mxu0 %v3871_v20  ;;  %v3967_v20 = vld [vmem:[#allocation5 + $0x698] ss:$24 sps:$4 sm:$0xff]  }
  0xd2   :  { %2094 = vmatpush1.bf16.msra.mxu1 %v3874_v21  ;;  %1966 = vmatprep.subr.bf16.mxu0 %v3879_v22  ;;  %v3972_v21 = vld [vmem:[#allocation5 + $0x6c4] ss:$24 sps:$4 sm:$0xff]  }
  0xd3   :  { %2095 = vmatprep.subr.bf16.mxu1 %v3882_v23  ;;  %v3975_v22 = vld [vmem:[#allocation5 + $0x6cc] ss:$24 sps:$4 sm:$0xff]   ;;  %v3970_v23 = vld [vmem:[#allocation5 + $0x6c0] ss:$24 sps:$4 sm:$0xff]  }
  0xd5   :  { %1967 = vmatpush1.bf16.msra.mxu0 %v3877_v24  ;;  %v3973_v24 = vld [vmem:[#allocation5 + $0x6c8] ss:$24 sps:$4 sm:$0xff]  }
  0xd6   :  { %2096 = vmatpush1.bf16.msra.mxu1 %v3880_v25  ;;  %1968 = vmatprep.subr.bf16.mxu0 %v3885_v26  ;;  %v3978_v25 = vld [vmem:[#allocation5 + $0x6f4] ss:$24 sps:$4 sm:$0xff]  }
  0xd7   :  { %2097 = vmatprep.subr.bf16.mxu1 %v3888_v27  ;;  %v3981_v26 = vld [vmem:[#allocation5 + $0x6fc] ss:$24 sps:$4 sm:$0xff]   ;;  %v3976_v27 = vld [vmem:[#allocation5 + $0x6f0] ss:$24 sps:$4 sm:$0xff]  }
  0xd9   :  { %1969 = vmatpush1.bf16.msra.mxu0 %v3883_v28  ;;  %v3979_v28 = vld [vmem:[#allocation5 + $0x6f8] ss:$24 sps:$4 sm:$0xff]  }
  0xda   :  { %2098 = vmatpush1.bf16.msra.mxu1 %v3886_v29  ;;  %1970 = vmatprep.subr.bf16.mxu0 %v3891_v31  ;;  %v3984_v29 = vld [vmem:[#allocation5 + $0x724] ss:$24 sps:$4 sm:$0xff]   ;;  %v3982_v31 = vld [vmem:[#allocation5 + $0x720] ss:$24 sps:$4 sm:$0xff]  }
  0xdb   :  { %2099 = vmatprep.subr.bf16.mxu1 %v3894_v32  ;;  %v3985_v32 = vld [vmem:[#allocation5 + $0x728] ss:$24 sps:$4 sm:$0xff]  }
  0xdd   :  { %1971 = vmatpush1.bf16.msra.mxu0 %v3889_v33  ;;  %v3990_v33 = vld [vmem:[#allocation5 + $0x754] ss:$24 sps:$4 sm:$0xff]  }
  0xde   :  { %2100 = vmatpush1.bf16.msra.mxu1 %v3892_v34  ;;  %1972 = vmatprep.subr.bf16.mxu0 %v3897_v35  ;;  %v3993_v34 = vld [vmem:[#allocation5 + $0x75c] ss:$24 sps:$4 sm:$0xff]   ;;  %v3988_v35 = vld [vmem:[#allocation5 + $0x750] ss:$24 sps:$4 sm:$0xff]  }
  0xdf   :  { %2101 = vmatprep.subr.bf16.mxu1 %v3900_v36  ;;  %v3991_v36 = vld [vmem:[#allocation5 + $0x758] ss:$24 sps:$4 sm:$0xff]  }
  0xe1   :  { %1973 = vmatpush1.bf16.msra.mxu0 %v3895_v37  ;;  %v3996_v37 = vld [vmem:[#allocation5 + $0x784] ss:$24 sps:$4 sm:$0xff]  }
  0xe2   :  { %2102 = vmatpush1.bf16.msra.mxu1 %v3898_v38  ;;  %1974 = vmatprep.subr.bf16.mxu0 %v3903_v39  ;;  %v3999_v38 = vld [vmem:[#allocation5 + $0x78c] ss:$24 sps:$4 sm:$0xff]   ;;  %v3994_v39 = vld [vmem:[#allocation5 + $0x780] ss:$24 sps:$4 sm:$0xff]  }
  0xe3   :  { %2103 = vmatprep.subr.bf16.mxu1 %v3906_v40  ;;  %v3997_v40 = vld [vmem:[#allocation5 + $0x788] ss:$24 sps:$4 sm:$0xff]  }
  0xe5   :  { %1975 = vmatpush1.bf16.msra.mxu0 %v3901_v41  ;;  %v4002_v41 = vld [vmem:[#allocation5 + $0x7b4] ss:$24 sps:$4 sm:$0xff]  }
  0xe6   :  { %2104 = vmatpush1.bf16.msra.mxu1 %v3904_v42  ;;  %1976 = vmatprep.subr.bf16.mxu0 %v3909_v43  ;;  %v4005_v42 = vld [vmem:[#allocation5 + $0x7bc] ss:$24 sps:$4 sm:$0xff]   ;;  %v4000_v43 = vld [vmem:[#allocation5 + $0x7b0] ss:$24 sps:$4 sm:$0xff]  }
  0xe7   :  { %2105 = vmatprep.subr.bf16.mxu1 %v3912_v44  ;;  %v4003_v44 = vld [vmem:[#allocation5 + $0x7b8] ss:$24 sps:$4 sm:$0xff]  }
  0xe9   :  { %1977 = vmatpush1.bf16.msra.mxu0 %v3907_v45  ;;  %v4008_v45 = vld [vmem:[#allocation5 + $0x7e4] ss:$24 sps:$4 sm:$0xff]  }
  0xea   :  { %2106 = vmatpush1.bf16.msra.mxu1 %v3910_v46  ;;  %1978 = vmatprep.subr.bf16.mxu0 %v3915_v47  ;;  %v4011_v46 = vld [vmem:[#allocation5 + $0x7ec] ss:$24 sps:$4 sm:$0xff]   ;;  %v4006_v47 = vld [vmem:[#allocation5 + $0x7e0] ss:$24 sps:$4 sm:$0xff]  }
  0xeb   :  { %2107 = vmatprep.subr.bf16.mxu1 %v3918_v48  ;;  %v4009_v48 = vld [vmem:[#allocation5 + $0x7e8] ss:$24 sps:$4 sm:$0xff]  }
  0xed   :  { %1979 = vmatpush1.bf16.msra.mxu0 %v3913_v49  ;;  %v4014_v49 = vld [vmem:[#allocation5 + $0x814] ss:$24 sps:$4 sm:$0xff]  }
  0xee   :  { %2108 = vmatpush1.bf16.msra.mxu1 %v3916_v50  ;;  %1980 = vmatprep.subr.bf16.mxu0 %v3921_v51  ;;  %v4017_v50 = vld [vmem:[#allocation5 + $0x81c] ss:$24 sps:$4 sm:$0xff]   ;;  %v4012_v51 = vld [vmem:[#allocation5 + $0x810] ss:$24 sps:$4 sm:$0xff]  }
  0xef   :  { %2109 = vmatprep.subr.bf16.mxu1 %v3924_v52  ;;  %v4015_v52 = vld [vmem:[#allocation5 + $0x818] ss:$24 sps:$4 sm:$0xff]  }
  0xf1   :  { %1981 = vmatpush1.bf16.msra.mxu0 %v3919_v53  ;;  %v4020_v53 = vld [vmem:[#allocation5 + $0x844] ss:$24 sps:$4 sm:$0xff]  }
  0xf2   :  { %2110 = vmatpush1.bf16.msra.mxu1 %v3922_v54  ;;  %1982 = vmatprep.subr.bf16.mxu0 %v3927_v55  ;;  %v4023_v54 = vld [vmem:[#allocation5 + $0x84c] ss:$24 sps:$4 sm:$0xff]   ;;  %v4018_v55 = vld [vmem:[#allocation5 + $0x840] ss:$24 sps:$4 sm:$0xff]  }
  0xf3   :  { %2111 = vmatprep.subr.bf16.mxu1 %v3930_v56  ;;  %v4021_v56 = vld [vmem:[#allocation5 + $0x848] ss:$24 sps:$4 sm:$0xff]  }
  0xf5   :  { %1983 = vmatpush1.bf16.msra.mxu0 %v3925_v57  ;;  %v4026_v57 = vld [vmem:[#allocation5 + $0x874] ss:$24 sps:$4 sm:$0xff]  }
  0xf6   :  { %2112 = vmatpush1.bf16.msra.mxu1 %v3928_v58  ;;  %1984 = vmatprep.subr.bf16.mxu0 %v3933_v59  ;;  %v4029_v58 = vld [vmem:[#allocation5 + $0x87c] ss:$24 sps:$4 sm:$0xff]   ;;  %v4024_v59 = vld [vmem:[#allocation5 + $0x870] ss:$24 sps:$4 sm:$0xff]  }
  0xf7   :  { %2113 = vmatprep.subr.bf16.mxu1 %v3936_v60  ;;  %v4027_v60 = vld [vmem:[#allocation5 + $0x878] ss:$24 sps:$4 sm:$0xff]  }
  0xf9   :  { %1985 = vmatpush1.bf16.msra.mxu0 %v3931_v61  ;;  %v4032_v61 = vld [vmem:[#allocation5 + $0x8a4] ss:$24 sps:$4 sm:$0xff]  }
  0xfa   :  { %2114 = vmatpush1.bf16.msra.mxu1 %v3934_v62  ;;  %1986 = vmatprep.subr.bf16.mxu0 %v3939_v63  ;;  %v4035_v62 = vld [vmem:[#allocation5 + $0x8ac] ss:$24 sps:$4 sm:$0xff]   ;;  %v4030_v63 = vld [vmem:[#allocation5 + $0x8a0] ss:$24 sps:$4 sm:$0xff]  }
  0xfb   :  { %2115 = vmatprep.subr.bf16.mxu1 %v3942_v0  ;;  %v4033_v0 = vld [vmem:[#allocation5 + $0x8a8] ss:$24 sps:$4 sm:$0xff]  }
  0xfd   :  { %1987 = vmatpush1.bf16.msra.mxu0 %v3937_v1  ;;  %v4038_v1 = vld [vmem:[#allocation5 + $0x8d4] ss:$24 sps:$4 sm:$0xff]  }
  0xfe   :  { %2116 = vmatpush1.bf16.msra.mxu1 %v3940_v2  ;;  %1999 = vmatprep.subr.bf16.mxu0 %v3948_v3  ;;  %v4041_v2 = vld [vmem:[#allocation5 + $0x8dc] ss:$24 sps:$4 sm:$0xff]   ;;  %v4036_v3 = vld [vmem:[#allocation5 + $0x8d0] ss:$24 sps:$4 sm:$0xff]  }
  0xff   :  { %2128 = vmatprep.subr.bf16.mxu1 %v3951_v4  ;;  %v4039_v4 = vld [vmem:[#allocation5 + $0x8d8] ss:$24 sps:$4 sm:$0xff]  }
 0x100   :  { %1989 = vmatmul.mubr.bf16.vlgmr.msra.gmra.mrb[0].mxu0 %v3943_v5 }
 0x101   :  { %2118 = vmatmul.mubr.bf16.vlgmr.msra.gmra.mrb[0].mxu1 %v3943_v5  ;;  %2000 = vmatpush1.bf16.msra.mxu0 %v3946_v6  ;;  %v4047_v5 = vld [vmem:[#allocation5 + $0x14] ss:$24 sps:$4 sm:$0xff]   ;;  %v4726_v6 = vld [vmem:[#allocation2 + $0x10] ss:$24 sps:$4 sm:$0xff]  }
 0x102   :  { %2129 = vmatpush1.bf16.msra.mxu1 %v3949_v7  ;;  %2001 = vmatprep.subr.bf16.mxu0 %v3954_v8  ;;  %v4045_v7 = vld [vmem:[#allocation5 + $0x10] ss:$24 sps:$4 sm:$0xff]   ;;  %v4050_v8 = vld [vmem:[#allocation5 + $0x44] ss:$24 sps:$4 sm:$0xff]  }
 0x103   :  { %2130 = vmatprep.subr.bf16.mxu1 %v3957_v9  ;;  %2031 = vmatprep.mubr.bf16.mxu0 %v4044_v12  ;;  %v4048_v9 = vld [vmem:[#allocation5 + $0x40] ss:$24 sps:$4 sm:$0xff]  }
 0x104   :  { %2160 = vmatprep.mubr.bf16.mxu1 %v4044_v12  ;;  %v4051_v12 = vld [vmem:[#allocation5 + $0x70] ss:$24 sps:$4 sm:$0xff]  }
 0x105   :  { %2002 = vmatpush1.bf16.msra.mxu0 %v3952_v10  ;;  %v4053_v10 = vld [vmem:[#allocation5 + $0x74] ss:$24 sps:$4 sm:$0xff]  }
 0x106   :  { %2131 = vmatpush1.bf16.msra.mxu1 %v3955_v11  ;;  %2003 = vmatprep.subr.bf16.mxu0 %v3960_v13  ;;  %v4381_v11 = vld [vmem:[#allocation2 + $0x4] ss:$24 sps:$4 sm:$0xff]   ;;  %v4056_v13 = vld [vmem:[#allocation5 + $0xa4] ss:$24 sps:$4 sm:$0xff]  }
 0x107   :  { %2132 = vmatprep.subr.bf16.mxu1 %v3963_v14  ;;  %v4054_v14 = vld [vmem:[#allocation5 + $0xa0] ss:$24 sps:$4 sm:$0xff]  }
 0x109   :  { %2004 = vmatpush1.bf16.msra.mxu0 %v3958_v15  ;;  %v4059_v15 = vld [vmem:[#allocation5 + $0xd4] ss:$24 sps:$4 sm:$0xff]  }
 0x10a   :  { %2133 = vmatpush1.bf16.msra.mxu1 %v3961_v16  ;;  %2005 = vmatprep.subr.bf16.mxu0 %v3966_v17  ;;  %v4057_v16 = vld [vmem:[#allocation5 + $0xd0] ss:$24 sps:$4 sm:$0xff]   ;;  %v4062_v17 = vld [vmem:[#allocation5 + $0x104] ss:$24 sps:$4 sm:$0xff]  }
 0x10b   :  { %2134 = vmatprep.subr.bf16.mxu1 %v3969_v18  ;;  %v4060_v18 = vld [vmem:[#allocation5 + $0x100] ss:$24 sps:$4 sm:$0xff]  }
 0x10d   :  { %2006 = vmatpush1.bf16.msra.mxu0 %v3964_v19  ;;  %v4065_v19 = vld [vmem:[#allocation5 + $0x134] ss:$24 sps:$4 sm:$0xff]  }
 0x10e   :  { %2135 = vmatpush1.bf16.msra.mxu1 %v3967_v20  ;;  %2007 = vmatprep.subr.bf16.mxu0 %v3972_v21  ;;  %v4063_v20 = vld [vmem:[#allocation5 + $0x130] ss:$24 sps:$4 sm:$0xff]   ;;  %v4068_v21 = vld [vmem:[#allocation5 + $0x164] ss:$24 sps:$4 sm:$0xff]  }
 0x10f   :  { %2136 = vmatprep.subr.bf16.mxu1 %v3975_v22  ;;  %v4066_v22 = vld [vmem:[#allocation5 + $0x160] ss:$24 sps:$4 sm:$0xff]  }
 0x111   :  { %2008 = vmatpush1.bf16.msra.mxu0 %v3970_v23  ;;  %v4071_v23 = vld [vmem:[#allocation5 + $0x194] ss:$24 sps:$4 sm:$0xff]  }
 0x112   :  { %2137 = vmatpush1.bf16.msra.mxu1 %v3973_v24  ;;  %2009 = vmatprep.subr.bf16.mxu0 %v3978_v25  ;;  %v4069_v24 = vld [vmem:[#allocation5 + $0x190] ss:$24 sps:$4 sm:$0xff]   ;;  %v4074_v25 = vld [vmem:[#allocation5 + $0x1c4] ss:$24 sps:$4 sm:$0xff]  }
 0x113   :  { %2138 = vmatprep.subr.bf16.mxu1 %v3981_v26  ;;  %v4072_v26 = vld [vmem:[#allocation5 + $0x1c0] ss:$24 sps:$4 sm:$0xff]  }
 0x115   :  { %2010 = vmatpush1.bf16.msra.mxu0 %v3976_v27  ;;  %v4077_v27 = vld [vmem:[#allocation5 + $0x1f4] ss:$24 sps:$4 sm:$0xff]  }
 0x116   :  { %2139 = vmatpush1.bf16.msra.mxu1 %v3979_v28  ;;  %2011 = vmatprep.subr.bf16.mxu0 %v3984_v29  ;;  %v4173_v28 = vld [vmem:[#allocation8 + $0x4] ss:$8 sps:$4 sm:$0xff]  }
 0x117   :  { %2140 = vmatprep.subr.bf16.mxu1 %v3987_v30  ;;  %v4075_v29 = vld [vmem:[#allocation5 + $0x1f0] ss:$24 sps:$4 sm:$0xff]   ;;  %v4080_v30 = vld [vmem:[#allocation5 + $0x224] ss:$24 sps:$4 sm:$0xff]  }
 0x119   :  { %2012 = vmatpush1.bf16.msra.mxu0 %v3982_v31  ;;  %v4171_v31 = vld [vmem:[#allocation8] ss:$8 sps:$4 sm:$0xff]  }
 0x11a   :  { %2141 = vmatpush1.bf16.msra.mxu1 %v3985_v32  ;;  %2013 = vmatprep.subr.bf16.mxu0 %v3990_v33  ;;  %v4179_v32 = vld [vmem:[#allocation8 + $0x14] ss:$8 sps:$4 sm:$0xff]  }
 0x11b   :  { %2142 = vmatprep.subr.bf16.mxu1 %v3993_v34  ;;  %v4078_v33 = vld [vmem:[#allocation5 + $0x220] ss:$24 sps:$4 sm:$0xff]  }
 0x11c   :  { %v4177_v34 = vld [vmem:[#allocation8 + $0x10] ss:$8 sps:$4 sm:$0xff]  }
 0x11d   :  { %2014 = vmatpush1.bf16.msra.mxu0 %v3988_v35  ;;  %v4083_v35 = vld [vmem:[#allocation5 + $0x254] ss:$24 sps:$4 sm:$0xff]  }
 0x11e   :  { %2143 = vmatpush1.bf16.msra.mxu1 %v3991_v36  ;;  %2015 = vmatprep.subr.bf16.mxu0 %v3996_v37  ;;  %v4185_v36 = vld [vmem:[#allocation8 + $0x24] ss:$8 sps:$4 sm:$0xff]  }
 0x11f   :  { %2144 = vmatprep.subr.bf16.mxu1 %v3999_v38  ;;  %v4081_v37 = vld [vmem:[#allocation5 + $0x250] ss:$24 sps:$4 sm:$0xff]  }
 0x120   :  { %v4183_v38 = vld [vmem:[#allocation8 + $0x20] ss:$8 sps:$4 sm:$0xff]  }
 0x121   :  { %2016 = vmatpush1.bf16.msra.mxu0 %v3994_v39  ;;  %v4086_v39 = vld [vmem:[#allocation5 + $0x284] ss:$24 sps:$4 sm:$0xff]  }
 0x122   :  { %2145 = vmatpush1.bf16.msra.mxu1 %v3997_v40  ;;  %2017 = vmatprep.subr.bf16.mxu0 %v4002_v41  ;;  %v4191_v40 = vld [vmem:[#allocation8 + $0x34] ss:$8 sps:$4 sm:$0xff]  }
 0x123   :  { %2146 = vmatprep.subr.bf16.mxu1 %v4005_v42  ;;  %v4084_v41 = vld [vmem:[#allocation5 + $0x280] ss:$24 sps:$4 sm:$0xff]  }
 0x124   :  { %v4189_v42 = vld [vmem:[#allocation8 + $0x30] ss:$8 sps:$4 sm:$0xff]  }
 0x125   :  { %2018 = vmatpush1.bf16.msra.mxu0 %v4000_v43  ;;  %v4089_v43 = vld [vmem:[#allocation5 + $0x2b4] ss:$24 sps:$4 sm:$0xff]  }
 0x126   :  { %2147 = vmatpush1.bf16.msra.mxu1 %v4003_v44  ;;  %2019 = vmatprep.subr.bf16.mxu0 %v4008_v45  ;;  %v4197_v44 = vld [vmem:[#allocation8 + $0x44] ss:$8 sps:$4 sm:$0xff]  }
 0x127   :  { %2148 = vmatprep.subr.bf16.mxu1 %v4011_v46  ;;  %v4087_v45 = vld [vmem:[#allocation5 + $0x2b0] ss:$24 sps:$4 sm:$0xff]  }
 0x128   :  { %v4195_v46 = vld [vmem:[#allocation8 + $0x40] ss:$8 sps:$4 sm:$0xff]  }
 0x129   :  { %2020 = vmatpush1.bf16.msra.mxu0 %v4006_v47  ;;  %v4092_v47 = vld [vmem:[#allocation5 + $0x2e4] ss:$24 sps:$4 sm:$0xff]  }
 0x12a   :  { %2149 = vmatpush1.bf16.msra.mxu1 %v4009_v48  ;;  %2021 = vmatprep.subr.bf16.mxu0 %v4014_v49  ;;  %v4203_v48 = vld [vmem:[#allocation8 + $0x54] ss:$8 sps:$4 sm:$0xff]  }
 0x12b   :  { %2150 = vmatprep.subr.bf16.mxu1 %v4017_v50  ;;  %v4090_v49 = vld [vmem:[#allocation5 + $0x2e0] ss:$24 sps:$4 sm:$0xff]  }
 0x12c   :  { %v4201_v50 = vld [vmem:[#allocation8 + $0x50] ss:$8 sps:$4 sm:$0xff]  }
 0x12d   :  { %2022 = vmatpush1.bf16.msra.mxu0 %v4012_v51  ;;  %v4095_v51 = vld [vmem:[#allocation5 + $0x314] ss:$24 sps:$4 sm:$0xff]  }
 0x12e   :  { %2151 = vmatpush1.bf16.msra.mxu1 %v4015_v52  ;;  %2023 = vmatprep.subr.bf16.mxu0 %v4020_v53  ;;  %v4209_v52 = vld [vmem:[#allocation8 + $0x64] ss:$8 sps:$4 sm:$0xff]  }
 0x12f   :  { %2152 = vmatprep.subr.bf16.mxu1 %v4023_v54  ;;  %v4093_v53 = vld [vmem:[#allocation5 + $0x310] ss:$24 sps:$4 sm:$0xff]  }
 0x130   :  { %v4207_v54 = vld [vmem:[#allocation8 + $0x60] ss:$8 sps:$4 sm:$0xff]  }
 0x131   :  { %2024 = vmatpush1.bf16.msra.mxu0 %v4018_v55  ;;  %v4098_v55 = vld [vmem:[#allocation5 + $0x344] ss:$24 sps:$4 sm:$0xff]  }
 0x132   :  { %2153 = vmatpush1.bf16.msra.mxu1 %v4021_v56  ;;  %2025 = vmatprep.subr.bf16.mxu0 %v4026_v57  ;;  %v4382_v56 = vld [vmem:[#allocation2] ss:$24 sps:$4 sm:$0xff]   ;;  %v4210_v57 = vld [vmem:[#allocation8 + $0x70] ss:$8 sps:$4 sm:$0xff]  }
 0x133   :  { %2154 = vmatprep.subr.bf16.mxu1 %v4029_v58  ;;  %v4212_v58 = vld [vmem:[#allocation8 + $0x74] ss:$8 sps:$4 sm:$0xff]  }
 0x135   :  { %2026 = vmatpush1.bf16.msra.mxu0 %v4024_v59  ;;  %v4096_v59 = vld [vmem:[#allocation5 + $0x340] ss:$24 sps:$4 sm:$0xff]  }
 0x136   :  { %2155 = vmatpush1.bf16.msra.mxu1 %v4027_v60  ;;  %2027 = vmatprep.subr.bf16.mxu0 %v4032_v61  ;;  %v4383_v60 = vld [vmem:[#allocation2 + $0xc] ss:$24 sps:$4 sm:$0xff]  }
 0x137   :  { %2156 = vmatprep.subr.bf16.mxu1 %v4035_v62  ;;  %v4215_v61 = vld [vmem:[#allocation8 + $0x84] ss:$8 sps:$4 sm:$0xff]  }
 0x138   :  { %v4101_v62 = vld [vmem:[#allocation5 + $0x374] ss:$24 sps:$4 sm:$0xff]  }
 0x139   :  { %2028 = vmatpush1.bf16.msra.mxu0 %v4030_v63  ;;  %v4213_v63 = vld [vmem:[#allocation8 + $0x80] ss:$8 sps:$4 sm:$0xff]  }
 0x13a   :  { %2157 = vmatpush1.bf16.msra.mxu1 %v4033_v0  ;;  %2029 = vmatprep.subr.bf16.mxu0 %v4038_v1  ;;  %v4218_v0 = vld [vmem:[#allocation8 + $0x94] ss:$8 sps:$4 sm:$0xff]   ;;  %v4099_v1 = vld [vmem:[#allocation5 + $0x370] ss:$24 sps:$4 sm:$0xff]  }
 0x13b   :  { %2158 = vmatprep.subr.bf16.mxu1 %v4041_v2  ;;  %v4104_v2 = vld [vmem:[#allocation5 + $0x3a4] ss:$24 sps:$4 sm:$0xff]  }
 0x13d   :  { %2030 = vmatpush1.bf16.msra.mxu0 %v4036_v3  ;;  %v4216_v3 = vld [vmem:[#allocation8 + $0x90] ss:$8 sps:$4 sm:$0xff]  }
 0x13e   :  { %2159 = vmatpush1.bf16.msra.mxu1 %v4039_v4  ;;  %2171 = vmatprep.subr.bf16.mxu0 %v4047_v5  ;;  %v4221_v4 = vld [vmem:[#allocation8 + $0xa4] ss:$8 sps:$4 sm:$0xff]   ;;  %v4102_v5 = vld [vmem:[#allocation5 + $0x3a0] ss:$24 sps:$4 sm:$0xff]  }
 0x13f   :  { %2906 = vmatprep.subr.bf16.mxu1 %v4173_v28  ;;  %v4120_v28 = vld [vmem:[#allocation5 + $0x4c0] ss:$24 sps:$4 sm:$0xff]  }
 0x140   :  { %2032 = vmatmul.mubr.bf16.vlgmr.msra.gmra.mrb[0].mxu0 %v4726_v6 }
 0x141   :  { %2161 = vmatmul.mubr.bf16.vlgmr.msra.gmra.mrb[0].mxu1 %v4726_v6  ;;  %2172 = vmatpush1.bf16.msra.mxu0 %v4045_v7  ;;  %v4107_v7 = vld [vmem:[#allocation5 + $0x3d4] ss:$24 sps:$4 sm:$0xff]  }
 0x142   :  { %2203 = vmatprep.mubr.bf16.mxu0 %v4381_v11  ;;  %2173 = vmatprep.subr.bf16.mxu0 %v4050_v8  ;;  %v4219_v8 = vld [vmem:[#allocation8 + $0xa0] ss:$8 sps:$4 sm:$0xff]  }
 0x143   :  { %2907 = vmatpush1.bf16.msra.mxu1 %v4171_v31  ;;  %v4110_v11 = vld [vmem:[#allocation5 + $0x404] ss:$24 sps:$4 sm:$0xff]   ;;  %v4123_v31 = vld [vmem:[#allocation5 + $0x4f0] ss:$24 sps:$4 sm:$0xff]  }
 0x144   :  { %2908 = vmatprep.subr.bf16.mxu1 %v4179_v32  ;;  %v4128_v32 = vld [vmem:[#allocation5 + $0x524] ss:$24 sps:$4 sm:$0xff]  }
 0x145   :  { %2174 = vmatpush1.bf16.msra.mxu0 %v4048_v9  ;;  %v4224_v9 = vld [vmem:[#allocation8 + $0xb4] ss:$8 sps:$4 sm:$0xff]  }
 0x146   :  { %2175 = vmatprep.subr.bf16.mxu0 %v4053_v10  ;;  %v4105_v10 = vld [vmem:[#allocation5 + $0x3d0] ss:$24 sps:$4 sm:$0xff]  }
 0x147   :  { %2909 = vmatpush1.bf16.msra.mxu1 %v4177_v34  ;;  %v4126_v34 = vld [vmem:[#allocation5 + $0x520] ss:$24 sps:$4 sm:$0xff]  }
 0x148   :  { %2910 = vmatprep.subr.bf16.mxu1 %v4185_v36  ;;  %v4129_v36 = vld [vmem:[#allocation5 + $0x550] ss:$24 sps:$4 sm:$0xff]  }
 0x149   :  { %2176 = vmatpush1.bf16.msra.mxu0 %v4051_v12  ;;  %v4222_v12 = vld [vmem:[#allocation8 + $0xb0] ss:$8 sps:$4 sm:$0xff]  }
 0x14a   :  { %2177 = vmatprep.subr.bf16.mxu0 %v4056_v13  ;;  %v4108_v13 = vld [vmem:[#allocation5 + $0x400] ss:$24 sps:$4 sm:$0xff]  }
 0x14b   :  { %2911 = vmatpush1.bf16.msra.mxu1 %v4183_v38  ;;  %v4132_v38 = vld [vmem:[#allocation5 + $0x580] ss:$24 sps:$4 sm:$0xff]  }
 0x14c   :  { %2912 = vmatprep.subr.bf16.mxu1 %v4191_v40  ;;  %v4135_v40 = vld [vmem:[#allocation5 + $0x5b0] ss:$24 sps:$4 sm:$0xff]  }
 0x14d   :  { %2178 = vmatpush1.bf16.msra.mxu0 %v4054_v14  ;;  %v4113_v14 = vld [vmem:[#allocation5 + $0x434] ss:$24 sps:$4 sm:$0xff]  }
 0x14e   :  { %2179 = vmatprep.subr.bf16.mxu0 %v4059_v15  ;;  %v4111_v15 = vld [vmem:[#allocation5 + $0x430] ss:$24 sps:$4 sm:$0xff]  }
 0x14f   :  { %2913 = vmatpush1.bf16.msra.mxu1 %v4189_v42  ;;  %v4138_v42 = vld [vmem:[#allocation5 + $0x5e0] ss:$24 sps:$4 sm:$0xff]  }
 0x150   :  { %2914 = vmatprep.subr.bf16.mxu1 %v4197_v44  ;;  %v4141_v44 = vld [vmem:[#allocation5 + $0x610] ss:$24 sps:$4 sm:$0xff]  }
 0x151   :  { %2180 = vmatpush1.bf16.msra.mxu0 %v4057_v16  ;;  %v4116_v16 = vld [vmem:[#allocation5 + $0x464] ss:$24 sps:$4 sm:$0xff]  }
 0x152   :  { %2181 = vmatprep.subr.bf16.mxu0 %v4062_v17  ;;  %v4227_v17 = vld [vmem:[#allocation8 + $0xc4] ss:$8 sps:$4 sm:$0xff]  }
 0x153   :  { %2915 = vmatpush1.bf16.msra.mxu1 %v4195_v46  ;;  %v4384_v46 = vld [vmem:[#allocation2 + $0x8] ss:$24 sps:$4 sm:$0xff]  }
 0x154   :  { %2916 = vmatprep.subr.bf16.mxu1 %v4203_v48  ;;  %v4385_v48 = vld [vmem:[#allocation2 + $0x14] ss:$24 sps:$4 sm:$0xff]  }
 0x155   :  { %2182 = vmatpush1.bf16.msra.mxu0 %v4060_v18  ;;  %v4114_v18 = vld [vmem:[#allocation5 + $0x460] ss:$24 sps:$4 sm:$0xff]  }
 0x156   :  { %2183 = vmatprep.subr.bf16.mxu0 %v4065_v19  ;;  %v4225_v19 = vld [vmem:[#allocation8 + $0xc0] ss:$8 sps:$4 sm:$0xff]  }
 0x157   :  { %2917 = vmatpush1.bf16.msra.mxu1 %v4201_v50  ;;  %v4147_v50 = vld [vmem:[#allocation5 + $0x670] ss:$24 sps:$4 sm:$0xff]  }
 0x158   :  { %2918 = vmatprep.subr.bf16.mxu1 %v4209_v52  ;;  %v4150_v52 = vld [vmem:[#allocation5 + $0x6a0] ss:$24 sps:$4 sm:$0xff]  }
 0x159   :  { %2184 = vmatpush1.bf16.msra.mxu0 %v4063_v20  ;;  %v4119_v20 = vld [vmem:[#allocation5 + $0x494] ss:$24 sps:$4 sm:$0xff]  }
 0x15a   :  { %2185 = vmatprep.subr.bf16.mxu0 %v4068_v21  ;;  %v4230_v21 = vld [vmem:[#allocation8 + $0xd4] ss:$8 sps:$4 sm:$0xff]  }
 0x15b   :  { %2919 = vmatpush1.bf16.msra.mxu1 %v4207_v54  ;;  %v4153_v54 = vld [vmem:[#allocation5 + $0x6d0] ss:$24 sps:$4 sm:$0xff]  }
 0x15c   :  { %2920 = vmatprep.subr.bf16.mxu1 %v4212_v58  ;;  %v4159_v58 = vld [vmem:[#allocation5 + $0x730] ss:$24 sps:$4 sm:$0xff]  }
 0x15d   :  { %2186 = vmatpush1.bf16.msra.mxu0 %v4066_v22  ;;  %v4117_v22 = vld [vmem:[#allocation5 + $0x490] ss:$24 sps:$4 sm:$0xff]  }
 0x15e   :  { %2187 = vmatprep.subr.bf16.mxu0 %v4071_v23  ;;  %v4228_v23 = vld [vmem:[#allocation8 + $0xd0] ss:$8 sps:$4 sm:$0xff]  }
 0x15f   :  { %2921 = vmatpush1.bf16.msra.mxu1 %v4210_v57  ;;  %v4161_v57 = vld [vmem:[#allocation5 + $0x734] ss:$24 sps:$4 sm:$0xff]  }
 0x160   :  { %2922 = vmatprep.subr.bf16.mxu1 %v4215_v61  ;;  %v4167_v61 = vld [vmem:[#allocation5 + $0x794] ss:$24 sps:$4 sm:$0xff]  }
 0x161   :  { %2188 = vmatpush1.bf16.msra.mxu0 %v4069_v24  ;;  %v4233_v24 = vld [vmem:[#allocation8 + $0xe4] ss:$8 sps:$4 sm:$0xff]  }
 0x162   :  { %2189 = vmatprep.subr.bf16.mxu0 %v4074_v25  ;;  %v4122_v25 = vld [vmem:[#allocation5 + $0x4c4] ss:$24 sps:$4 sm:$0xff]  }
 0x163   :  { %2923 = vmatpush1.bf16.msra.mxu1 %v4213_v63  ;;  %v4170_v63 = vld [vmem:[#allocation5 + $0x7c4] ss:$24 sps:$4 sm:$0xff]  }
 0x164   :  { %2924 = vmatprep.subr.bf16.mxu1 %v4218_v0  ;;  %v4168_v0 = vld [vmem:[#allocation5 + $0x7c0] ss:$24 sps:$4 sm:$0xff]  }
 0x165   :  { %2190 = vmatpush1.bf16.msra.mxu0 %v4072_v26  ;;  %v4231_v26 = vld [vmem:[#allocation8 + $0xe0] ss:$8 sps:$4 sm:$0xff]  }
 0x166   :  { %2191 = vmatprep.subr.bf16.mxu0 %v4077_v27  ;;  %v4236_v27 = vld [vmem:[#allocation8 + $0xf4] ss:$8 sps:$4 sm:$0xff]  }
 0x167   :  { %2925 = vmatpush1.bf16.msra.mxu1 %v4216_v3  ;;  %v4182_v3 = vld [vmem:[#allocation5 + $0x824] ss:$24 sps:$4 sm:$0xff]  }
 0x168   :  { %2926 = vmatprep.subr.bf16.mxu1 %v4221_v4  ;;  %v4180_v4 = vld [vmem:[#allocation5 + $0x820] ss:$24 sps:$4 sm:$0xff]  }
 0x169   :  { %2192 = vmatpush1.bf16.msra.mxu0 %v4075_v29  ;;  %v4125_v29 = vld [vmem:[#allocation5 + $0x4f4] ss:$24 sps:$4 sm:$0xff]  }
 0x16a   :  { %2193 = vmatprep.subr.bf16.mxu0 %v4080_v30  ;;  %v4234_v30 = vld [vmem:[#allocation8 + $0xf0] ss:$8 sps:$4 sm:$0xff]  }
 0x16b   :  { %2927 = vmatpush1.bf16.msra.mxu1 %v4219_v8  ;;  %v4194_v8 = vld [vmem:[#allocation5 + $0x884] ss:$24 sps:$4 sm:$0xff]  }
 0x16c   :  { %2928 = vmatprep.subr.bf16.mxu1 %v4224_v9  ;;  %v4192_v9 = vld [vmem:[#allocation5 + $0x880] ss:$24 sps:$4 sm:$0xff]  }
 0x16d   :  { %2194 = vmatpush1.bf16.msra.mxu0 %v4078_v33  ;;  %v4239_v33 = vld [vmem:[#allocation8 + $0x104] ss:$8 sps:$4 sm:$0xff]  }
 0x16e   :  { %2195 = vmatprep.subr.bf16.mxu0 %v4083_v35  ;;  %v4131_v35 = vld [vmem:[#allocation5 + $0x554] ss:$24 sps:$4 sm:$0xff]  }
 0x16f   :  { %2929 = vmatpush1.bf16.msra.mxu1 %v4222_v12  ;;  %v4206_v12 = vld [vmem:[#allocation5 + $0x8e4] ss:$24 sps:$4 sm:$0xff]  }
 0x170   :  { %2930 = vmatprep.subr.bf16.mxu1 %v4227_v17 }
 0x171   :  { %2196 = vmatpush1.bf16.msra.mxu0 %v4081_v37  ;;  %v4134_v37 = vld [vmem:[#allocation5 + $0x584] ss:$24 sps:$4 sm:$0xff]  }
 0x172   :  { %2197 = vmatprep.subr.bf16.mxu0 %v4086_v39  ;;  %v4137_v39 = vld [vmem:[#allocation5 + $0x5b4] ss:$24 sps:$4 sm:$0xff]  }
 0x173   :  { %2931 = vmatpush1.bf16.msra.mxu1 %v4225_v19 }
 0x174   :  { %2932 = vmatprep.subr.bf16.mxu1 %v4230_v21 }
 0x175   :  { %2198 = vmatpush1.bf16.msra.mxu0 %v4084_v41  ;;  %v4140_v41 = vld [vmem:[#allocation5 + $0x5e4] ss:$24 sps:$4 sm:$0xff]  }
 0x176   :  { %2199 = vmatprep.subr.bf16.mxu0 %v4089_v43  ;;  %v4143_v43 = vld [vmem:[#allocation5 + $0x614] ss:$24 sps:$4 sm:$0xff]  }
 0x177   :  { %2933 = vmatpush1.bf16.msra.mxu1 %v4228_v23 }
 0x178   :  { %2934 = vmatprep.subr.bf16.mxu1 %v4233_v24 }
 0x179   :  { %2200 = vmatpush1.bf16.msra.mxu0 %v4087_v45  ;;  %v4146_v45 = vld [vmem:[#allocation5 + $0x644] ss:$24 sps:$4 sm:$0xff]  }
 0x17a   :  { %2201 = vmatprep.subr.bf16.mxu0 %v4092_v47  ;;  %v4144_v47 = vld [vmem:[#allocation5 + $0x640] ss:$24 sps:$4 sm:$0xff]  }
 0x17b   :  { %2935 = vmatpush1.bf16.msra.mxu1 %v4231_v26 }
 0x17c   :  { %2936 = vmatprep.subr.bf16.mxu1 %v4236_v27 }
 0x17d   :  { %2202 = vmatpush1.bf16.msra.mxu0 %v4090_v49  ;;  %v4149_v49 = vld [vmem:[#allocation5 + $0x674] ss:$24 sps:$4 sm:$0xff]  }
 0x17e   :  { %2214 = vmatprep.subr.bf16.mxu0 %v4095_v51  ;;  %v4152_v51 = vld [vmem:[#allocation5 + $0x6a4] ss:$24 sps:$4 sm:$0xff]  }
 0x17f   :  { %2937 = vmatpush1.bf16.msra.mxu1 %v4234_v30 }
 0x180   :  { %2204 = vmatmul.mubr.bf16.vlgmr.msra.gmra.mrb[4].mxu0 %v4382_v56  ;;  %2949 = vmatprep.subr.bf16.mxu1 %v4239_v33  ;;  %v4156_v56 = vld [vmem:[#allocation5 + $0x700] ss:$24 sps:$4 sm:$0xff]  }
 0x181   :  { %2215 = vmatpush1.bf16.msra.mxu0 %v4093_v53  ;;  %2246 = vmatprep.mubr.bf16.mxu0 %v4383_v60  ;;  %v4155_v53 = vld [vmem:[#allocation5 + $0x6d4] ss:$24 sps:$4 sm:$0xff]   ;;  %v4162_v60 = vld [vmem:[#allocation5 + $0x760] ss:$24 sps:$4 sm:$0xff]  }
 0x182   :  { %2216 = vmatprep.subr.bf16.mxu0 %v4098_v55  ;;  %v4158_v55 = vld [vmem:[#allocation5 + $0x704] ss:$24 sps:$4 sm:$0xff]  }
 0x185   :  { %2217 = vmatpush1.bf16.msra.mxu0 %v4096_v59  ;;  %v4164_v59 = vld [vmem:[#allocation5 + $0x764] ss:$24 sps:$4 sm:$0xff]  }
 0x186   :  { %2218 = vmatprep.subr.bf16.mxu0 %v4101_v62  ;;  %v4165_v62 = vld [vmem:[#allocation5 + $0x790] ss:$24 sps:$4 sm:$0xff]  }
 0x189   :  { %2219 = vmatpush1.bf16.msra.mxu0 %v4099_v1  ;;  %v4176_v1 = vld [vmem:[#allocation5 + $0x7f4] ss:$24 sps:$4 sm:$0xff]  }
 0x18a   :  { %2220 = vmatprep.subr.bf16.mxu0 %v4104_v2  ;;  %v4174_v2 = vld [vmem:[#allocation5 + $0x7f0] ss:$24 sps:$4 sm:$0xff]  }
 0x18d   :  { %2221 = vmatpush1.bf16.msra.mxu0 %v4102_v5  ;;  %v4188_v5 = vld [vmem:[#allocation5 + $0x854] ss:$24 sps:$4 sm:$0xff]  }
 0x18e   :  { %2222 = vmatprep.subr.bf16.mxu0 %v4107_v7  ;;  %v4186_v7 = vld [vmem:[#allocation5 + $0x850] ss:$24 sps:$4 sm:$0xff]  }
 0x191   :  { %2223 = vmatpush1.bf16.msra.mxu0 %v4105_v10  ;;  %v4200_v10 = vld [vmem:[#allocation5 + $0x8b4] ss:$24 sps:$4 sm:$0xff]  }
 0x192   :  { %2224 = vmatprep.subr.bf16.mxu0 %v4110_v11  ;;  %v4198_v11 = vld [vmem:[#allocation5 + $0x8b0] ss:$24 sps:$4 sm:$0xff]  }
 0x195   :  { %2225 = vmatpush1.bf16.msra.mxu0 %v4108_v13  ;;  %v4204_v13 = vld [vmem:[#allocation5 + $0x8e0] ss:$24 sps:$4 sm:$0xff]  }
 0x196   :  { %2226 = vmatprep.subr.bf16.mxu0 %v4113_v14  ;;  %v413_v14 = vlaneseq }
 0x199   :  { %2227 = vmatpush1.bf16.msra.mxu0 %v4111_v15  ;;  %v4731_v15 = vshrl.u32 %v413_v14, 7  ;;  %v4278_v14 = vld [vmem:[#allocation8 + $0x1d4] ss:$8 sps:$4 sm:$0xff]  }
 0x19a   :  { %2228 = vmatprep.subr.bf16.mxu0 %v4116_v16 }
 0x19b   :  { %v415_v16 = vsub.s32 0, %v4731_v15  ;;  %v423_v17 = vsub.s32 2, %v4731_v15  ;;  %v419_v19 = vsub.s32 1, %v4731_v15 }
 0x19d   :  { %2229 = vmatpush1.bf16.msra.mxu0 %v4114_v18  ;;  %v4735_v18 = vld [vmem:[#allocation7] sm:$0x3f] }
 0x19e   :  { %2230 = vmatprep.subr.bf16.mxu0 %v4119_v20  ;;  %v427_v20 = vsub.s32 3, %v4731_v15  ;;  %v416_v21 = vrot.slane %v4735_v18, %v415_v16 }
 0x1a0   :  { %v428_v23 = vrot.slane %v4735_v18, %v427_v20  ;;  %v4281_v20 = vld [vmem:[#allocation8 + $0x1e4] ss:$8 sps:$4 sm:$0xff]  }
 0x1a1   :  { %2231 = vmatpush1.bf16.msra.mxu0 %v4117_v22  ;;  %v424_v22 = vrot.slane %v4735_v18, %v423_v17  ;;  %v4276_v17 = vld [vmem:[#allocation8 + $0x1d0] ss:$8 sps:$4 sm:$0xff]  }
 0x1a2   :  { %2232 = vmatprep.subr.bf16.mxu0 %v4122_v25 }
 0x1a5   :  { %2233 = vmatpush1.bf16.msra.mxu0 %v4120_v28 }
 0x1a6   :  { %2234 = vmatprep.subr.bf16.mxu0 %v4125_v29 }
 0x1a9   :  { %2235 = vmatpush1.bf16.msra.mxu0 %v4123_v31 }
 0x1aa   :  { %2236 = vmatprep.subr.bf16.mxu0 %v4128_v32 }
 0x1ad   :  { %2237 = vmatpush1.bf16.msra.mxu0 %v4126_v34 }
 0x1ae   :  { %2238 = vmatprep.subr.bf16.mxu0 %v4131_v35 }
 0x1b1   :  { %2239 = vmatpush1.bf16.msra.mxu0 %v4129_v36 }
 0x1b2   :  { %2240 = vmatprep.subr.bf16.mxu0 %v4134_v37 }
 0x1b5   :  { %2241 = vmatpush1.bf16.msra.mxu0 %v4132_v38 }
 0x1b6   :  { %2242 = vmatprep.subr.bf16.mxu0 %v4137_v39 }
 0x1b9   :  { %2243 = vmatpush1.bf16.msra.mxu0 %v4135_v40 }
 0x1ba   :  { %2244 = vmatprep.subr.bf16.mxu0 %v4140_v41 }
 0x1bd   :  { %2245 = vmatpush1.bf16.msra.mxu0 %v4138_v42 }
 0x1be   :  { %2257 = vmatprep.subr.bf16.mxu0 %v4143_v43 }
 0x1c0   :  { %2247 = vmatmul.mubr.bf16.vlgmr.msra.gmra.mrb[4].mxu0 %v4384_v46 }
 0x1c1   :  { %2258 = vmatpush1.bf16.msra.mxu0 %v4141_v44  ;;  %2289 = vmatprep.mubr.bf16.mxu0 %v4385_v48 }
 0x1c2   :  { %2259 = vmatprep.subr.bf16.mxu0 %v4146_v45 }
 0x1c5   :  { %2260 = vmatpush1.bf16.msra.mxu0 %v4144_v47 }
 0x1c6   :  { %2261 = vmatprep.subr.bf16.mxu0 %v4149_v49 }
 0x1c9   :  { %2262 = vmatpush1.bf16.msra.mxu0 %v4147_v50 }
 0x1ca   :  { %2263 = vmatprep.subr.bf16.mxu0 %v4152_v51  ;;  %v4237_v51 = vld [vmem:[#allocation8 + $0x100] ss:$8 sps:$4 sm:$0xff]  }
 0x1cd   :  { %2264 = vmatpush1.bf16.msra.mxu0 %v4150_v52 }
 0x1ce   :  { %2265 = vmatprep.subr.bf16.mxu0 %v4155_v53  ;;  %v4242_v53 = vld [vmem:[#allocation8 + $0x114] ss:$8 sps:$4 sm:$0xff]  }
 0x1d1   :  { %2266 = vmatpush1.bf16.msra.mxu0 %v4153_v54  ;;  %v4240_v54 = vld [vmem:[#allocation8 + $0x110] ss:$8 sps:$4 sm:$0xff]  }
 0x1d2   :  { %2267 = vmatprep.subr.bf16.mxu0 %v4158_v55  ;;  %v4245_v55 = vld [vmem:[#allocation8 + $0x124] ss:$8 sps:$4 sm:$0xff]  }
 0x1d5   :  { %2268 = vmatpush1.bf16.msra.mxu0 %v4156_v56  ;;  %v4243_v56 = vld [vmem:[#allocation8 + $0x120] ss:$8 sps:$4 sm:$0xff]  }
 0x1d6   :  { %2269 = vmatprep.subr.bf16.mxu0 %v4161_v57  ;;  %v4248_v57 = vld [vmem:[#allocation8 + $0x134] ss:$8 sps:$4 sm:$0xff]  }
 0x1d9   :  { %2270 = vmatpush1.bf16.msra.mxu0 %v4159_v58  ;;  %v4246_v58 = vld [vmem:[#allocation8 + $0x130] ss:$8 sps:$4 sm:$0xff]  }
 0x1da   :  { %2271 = vmatprep.subr.bf16.mxu0 %v4164_v59  ;;  %v4251_v59 = vld [vmem:[#allocation8 + $0x144] ss:$8 sps:$4 sm:$0xff]  }
 0x1dd   :  { %2272 = vmatpush1.bf16.msra.mxu0 %v4162_v60  ;;  %v4249_v60 = vld [vmem:[#allocation8 + $0x140] ss:$8 sps:$4 sm:$0xff]  }
 0x1de   :  { %2273 = vmatprep.subr.bf16.mxu0 %v4167_v61  ;;  %v4254_v61 = vld [vmem:[#allocation8 + $0x154] ss:$8 sps:$4 sm:$0xff]  }
 0x1e1   :  { %2274 = vmatpush1.bf16.msra.mxu0 %v4165_v62  ;;  %v4252_v62 = vld [vmem:[#allocation8 + $0x150] ss:$8 sps:$4 sm:$0xff]  }
 0x1e2   :  { %2275 = vmatprep.subr.bf16.mxu0 %v4170_v63  ;;  %v4257_v63 = vld [vmem:[#allocation8 + $0x164] ss:$8 sps:$4 sm:$0xff]  }
 0x1e5   :  { %2276 = vmatpush1.bf16.msra.mxu0 %v4168_v0  ;;  %v4255_v0 = vld [vmem:[#allocation8 + $0x160] ss:$8 sps:$4 sm:$0xff]  }
 0x1e6   :  { %2277 = vmatprep.subr.bf16.mxu0 %v4176_v1  ;;  %v4260_v1 = vld [vmem:[#allocation8 + $0x174] ss:$8 sps:$4 sm:$0xff]  }
 0x1e9   :  { %2278 = vmatpush1.bf16.msra.mxu0 %v4174_v2  ;;  %v4258_v2 = vld [vmem:[#allocation8 + $0x170] ss:$8 sps:$4 sm:$0xff]  }
 0x1ea   :  { %2279 = vmatprep.subr.bf16.mxu0 %v4182_v3  ;;  %v4263_v3 = vld [vmem:[#allocation8 + $0x184] ss:$8 sps:$4 sm:$0xff]  }
 0x1ed   :  { %2280 = vmatpush1.bf16.msra.mxu0 %v4180_v4  ;;  %v4261_v4 = vld [vmem:[#allocation8 + $0x180] ss:$8 sps:$4 sm:$0xff]  }
 0x1ee   :  { %2281 = vmatprep.subr.bf16.mxu0 %v4188_v5  ;;  %v4266_v5 = vld [vmem:[#allocation8 + $0x194] ss:$8 sps:$4 sm:$0xff]  }
 0x1f1   :  { %2282 = vmatpush1.bf16.msra.mxu0 %v4186_v7  ;;  %v4264_v7 = vld [vmem:[#allocation8 + $0x190] ss:$8 sps:$4 sm:$0xff]  }
 0x1f2   :  { %2283 = vmatprep.subr.bf16.mxu0 %v4194_v8  ;;  %v4269_v8 = vld [vmem:[#allocation8 + $0x1a4] ss:$8 sps:$4 sm:$0xff]  }
 0x1f5   :  { %2284 = vmatpush1.bf16.msra.mxu0 %v4192_v9  ;;  %v4267_v9 = vld [vmem:[#allocation8 + $0x1a0] ss:$8 sps:$4 sm:$0xff]  }
 0x1f6   :  { %2285 = vmatprep.subr.bf16.mxu0 %v4200_v10  ;;  %v4272_v10 = vld [vmem:[#allocation8 + $0x1b4] ss:$8 sps:$4 sm:$0xff]  }
 0x1f9   :  { %2286 = vmatpush1.bf16.msra.mxu0 %v4198_v11  ;;  %v4270_v11 = vld [vmem:[#allocation8 + $0x1b0] ss:$8 sps:$4 sm:$0xff]  }
 0x1fa   :  { %2287 = vmatprep.subr.bf16.mxu0 %v4206_v12  ;;  %v4275_v12 = vld [vmem:[#allocation8 + $0x1c4] ss:$8 sps:$4 sm:$0xff]  }
 0x1fd   :  { %2288 = vmatpush1.bf16.msra.mxu0 %v4204_v13  ;;  %v4273_v13 = vld [vmem:[#allocation8 + $0x1c0] ss:$8 sps:$4 sm:$0xff]  }
 0x200   :  { %2290 = vmatmul.mubr.bf16.vlgmr.msra.gmra.mrb[4].mxu0 %v4726_v6  ;;  %v420_v6 = vrot.slane %v4735_v18, %v419_v19 }
 0x213   :  { %v2033_v24 = vpop.f32.mrb[0].mxu0 }
 0x214   :  { %v2162_v25 = vpop.f32.mrb[0].mxu1  ;;  %v3686_v26 = vadd.f32 %v2033_v24, %v416_v21  ;;  %v2035_v28 = vpop.f32.mrb[1].mxu0  ;;  %v4285_v24 = vld [vmem:[#allocation8 + $0x200] ss:$8 sps:$4 sm:$0xff]  }
 0x215   :  { %v3690_v27 = vadd.f32 %v2162_v25, %v424_v22  ;;  %v2164_v29 = vpop.f32.mrb[1].mxu1  ;;  %v3687_v30 = vadd.f32 %v2035_v28, %v420_v6  ;;  %v2037_v32 = vpop.f32.mrb[2].mxu0  ;;  %v4333_v25 = vld [vmem:[#allocation11 + $0x40] sm:$0xff]   ;;  %v4290_v28 = vld [vmem:[#allocation8 + $0x214] ss:$8 sps:$4 sm:$0xff]  }
 0x216   :  { %v3691_v31 = vadd.f32 %v2164_v29, %v428_v23  ;;  %v2166_v33 = vpop.f32.mrb[2].mxu1  ;;  %4349 = vtanh.f32 %v3686_v26  ;;  %v3688_v34 = vadd.f32 %v2037_v32, %v416_v21  ;;  %v2039_v35 = vpop.f32.mrb[3].mxu0  ;;  %v4279_v21 = vld [vmem:[#allocation8 + $0x1e0] ss:$8 sps:$4 sm:$0xff]   ;;  %3664 = vmatprep.subr.bf16.mxu0 %v4333_v25  ;;  %v4293_v32 = vld [vmem:[#allocation8 + $0x224] ss:$8 sps:$4 sm:$0xff]  }
 0x217   :  { %v2168_v36 = vpop.f32.mrb[3].mxu1  ;;  %4351 = vtanh.f32 %v3690_v27  ;;  %v3692_v37 = vadd.f32 %v2166_v33, %v424_v22  ;;  %v3689_v38 = vadd.f32 %v2039_v35, %v420_v6  ;;  %v4284_v22 = vld [vmem:[#allocation8 + $0x1f4] ss:$8 sps:$4 sm:$0xff]   ;;  %v4282_v6 = vld [vmem:[#allocation8 + $0x1f0] ss:$8 sps:$4 sm:$0xff]   ;;  %v4334_v26 = vld [vmem:[#allocation11] sm:$0xff]  }
 0x218   :  { %4353 = vtanh.f32 %v3687_v30  ;;  %v3693_v39 = vadd.f32 %v2168_v36, %v428_v23  ;;  %v4287_v23 = vld [vmem:[#allocation8 + $0x204] ss:$8 sps:$4 sm:$0xff]   ;;  %3665 = vmatpush3.bf16.msra.mxu0 %v4334_v26  ;;  %v4288_v30 = vld [vmem:[#allocation8 + $0x210] ss:$8 sps:$4 sm:$0xff]   ;;  %v4296_v36 = vld [vmem:[#allocation8 + $0x234] ss:$8 sps:$4 sm:$0xff]  }
 0x219   :  { %4355 = vtanh.f32 %v3691_v31  ;;  %v4335_v27 = vld [vmem:[#allocation11 + $0x48] sm:$0xff]   ;;  %v4337_v31 = vld [vmem:[#allocation11 + $0x50] sm:$0xff]   ;;  %v4339_v35 = vld [vmem:[#allocation11 + $0x58] sm:$0xff]  }
 0x21a   :  { %4357 = vtanh.f32 %v3688_v34  ;;  %v4336_v29 = vld [vmem:[#allocation11 + $0x8] sm:$0xff]   ;;  %3666 = vmatprep.subr.bf16.mxu0 %v4335_v27  ;;  %v4338_v33 = vld [vmem:[#allocation11 + $0x10] sm:$0xff]   ;;  %v4347_v26 = vld [vmem:[#allocation11 + $0x78] sm:$0xff]  }
 0x21b   :  { %4359 = vtanh.f32 %v3692_v37  ;;  %v4291_v34 = vld [vmem:[#allocation8 + $0x220] ss:$8 sps:$4 sm:$0xff]   ;;  %v4346_v25 = vld [vmem:[#allocation11 + $0x30] sm:$0xff]  }
 0x21c   :  { %4361 = vtanh.f32 %v3689_v38  ;;  %3667 = vmatpush3.bf16.msra.mxu0 %v4336_v29  ;;  %v4340_v37 = vld [vmem:[#allocation11 + $0x18] sm:$0xff]  }
 0x21d   :  { %4363 = vtanh.f32 %v3693_v39  ;;  %3668 = vmatprep.subr.bf16.mxu0 %v4337_v31  ;;  %v4294_v38 = vld [vmem:[#allocation8 + $0x230] ss:$8 sps:$4 sm:$0xff]   ;;  %v4341_v39 = vld [vmem:[#allocation11 + $0x60] sm:$0xff]  }
 0x21e   :  { %v4348_v27 = vld [vmem:[#allocation11 + $0x38] sm:$0xff]  }
 0x220   :  { %v4350_v40 = vpop.eup %4349  ;;  %3669 = vmatpush3.bf16.msra.mxu0 %v4338_v33 }
 0x221   :  { %v4747_v41 = vpop.eup %4351  ;;  %3670 = vmatprep.subr.bf16.mxu0 %v4339_v35 }
 0x222   :  { %v4354_v42 = vpop.eup %4353 }
 0x223   :  { %v4356_v43 = vpop.eup %4355 }
 0x224   :  { %v4358_v44 = vpop.eup %4357  ;;  %3671 = vmatpush3.bf16.msra.mxu0 %v4340_v37 }
 0x225   :  { %v4749_v45 = vpop.eup %4359  ;;  %v2312_v46 = vpack.c.bf16 %v4358_v44, %v4350_v40  ;;  %v4299_v40 = vld [vmem:[#allocation8 + $0x244] ss:$8 sps:$4 sm:$0xff]   ;;  %3672 = vmatprep.subr.bf16.mxu0 %v4341_v39  ;;  %v4302_v44 = vld [vmem:[#allocation8 + $0x254] ss:$8 sps:$4 sm:$0xff]  }
 0x226   :  { %v4362_v47 = vpop.eup %4361  ;;  %v2314_v48 = vpack.c.bf16 %v4749_v45, %v4747_v41  ;;  %v4342_v41 = vld [vmem:[#allocation11 + $0x20] sm:$0xff]   ;;  %v4300_v45 = vld [vmem:[#allocation8 + $0x250] ss:$8 sps:$4 sm:$0xff]  }
 0x227   :  { %v4364_v49 = vpop.eup %4363  ;;  %v2313_v50 = vpack.c.bf16 %v4362_v47, %v4354_v42  ;;  %v4297_v42 = vld [vmem:[#allocation8 + $0x240] ss:$8 sps:$4 sm:$0xff]  }
 0x228   :  { %v2315_v52 = vpack.c.bf16 %v4364_v49, %v4356_v43  ;;  %v4343_v43 = vld [vmem:[#allocation11 + $0x68] sm:$0xff]   ;;  %3673 = vmatpush3.bf16.msra.mxu0 %v4342_v41 }
 0x229   :  { %2938 = vmatprep.mubr.bf16.mxu1 %v2313_v50  ;;  %3674 = vmatprep.subr.bf16.mxu0 %v4343_v43  ;;  %v4303_v47 = vld [vmem:[#allocation8 + $0x260] ss:$8 sps:$4 sm:$0xff]   ;;  %v4306_v49 = vld [vmem:[#allocation8 + $0x270] ss:$8 sps:$4 sm:$0xff]   ;;  %v4311_v50 = vld [vmem:[#allocation8 + $0x284] ss:$8 sps:$4 sm:$0xff]  }
 0x22a   :  { %2939 = vmatmul.mubr.bf16.vlgmr.msra.gmra.mrb[4].mxu1 %v2312_v46  ;;  %v4305_v46 = vld [vmem:[#allocation8 + $0x264] ss:$8 sps:$4 sm:$0xff]  }
 0x22b   :  { %2950 = vmatpush1.bf16.msra.mxu1 %v4237_v51  ;;  %2981 = vmatprep.mubr.bf16.mxu1 %v2315_v52  ;;  %v4309_v51 = vld [vmem:[#allocation8 + $0x280] ss:$8 sps:$4 sm:$0xff]   ;;  %v4314_v52 = vld [vmem:[#allocation8 + $0x294] ss:$8 sps:$4 sm:$0xff]  }
 0x22c   :  { %2951 = vmatprep.subr.bf16.mxu1 %v4242_v53  ;;  %v4312_v53 = vld [vmem:[#allocation8 + $0x290] ss:$8 sps:$4 sm:$0xff]  }
 0x22f   :  { %2952 = vmatpush1.bf16.msra.mxu1 %v4240_v54  ;;  %v4317_v54 = vld [vmem:[#allocation8 + $0x2a4] ss:$8 sps:$4 sm:$0xff]  }
 0x230   :  { %2953 = vmatprep.subr.bf16.mxu1 %v4245_v55  ;;  %v4315_v55 = vld [vmem:[#allocation8 + $0x2a0] ss:$8 sps:$4 sm:$0xff]  }
 0x233   :  { %2954 = vmatpush1.bf16.msra.mxu1 %v4243_v56  ;;  %v4320_v56 = vld [vmem:[#allocation8 + $0x2b4] ss:$8 sps:$4 sm:$0xff]  }
 0x234   :  { %2955 = vmatprep.subr.bf16.mxu1 %v4248_v57  ;;  %v4318_v57 = vld [vmem:[#allocation8 + $0x2b0] ss:$8 sps:$4 sm:$0xff]  }
 0x237   :  { %2956 = vmatpush1.bf16.msra.mxu1 %v4246_v58  ;;  %v4323_v58 = vld [vmem:[#allocation8 + $0x2c4] ss:$8 sps:$4 sm:$0xff]  }
 0x238   :  { %2957 = vmatprep.subr.bf16.mxu1 %v4251_v59  ;;  %v4321_v59 = vld [vmem:[#allocation8 + $0x2c0] ss:$8 sps:$4 sm:$0xff]  }
 0x23b   :  { %2958 = vmatpush1.bf16.msra.mxu1 %v4249_v60  ;;  %v4326_v60 = vld [vmem:[#allocation8 + $0x2d4] ss:$8 sps:$4 sm:$0xff]  }
 0x23c   :  { %2959 = vmatprep.subr.bf16.mxu1 %v4254_v61  ;;  %v4324_v61 = vld [vmem:[#allocation8 + $0x2d0] ss:$8 sps:$4 sm:$0xff]  }
 0x23f   :  { %2960 = vmatpush1.bf16.msra.mxu1 %v4252_v62  ;;  %v4329_v62 = vld [vmem:[#allocation8 + $0x2e4] ss:$8 sps:$4 sm:$0xff]  }
 0x240   :  { %2961 = vmatprep.subr.bf16.mxu1 %v4257_v63  ;;  %v4327_v63 = vld [vmem:[#allocation8 + $0x2e0] ss:$8 sps:$4 sm:$0xff]  }
 0x243   :  { %2962 = vmatpush1.bf16.msra.mxu1 %v4255_v0  ;;  %v4332_v0 = vld [vmem:[#allocation8 + $0x2f4] ss:$8 sps:$4 sm:$0xff]  }
 0x244   :  { %2963 = vmatprep.subr.bf16.mxu1 %v4260_v1  ;;  %v4330_v1 = vld [vmem:[#allocation8 + $0x2f0] ss:$8 sps:$4 sm:$0xff]  }
 0x247   :  { %2964 = vmatpush1.bf16.msra.mxu1 %v4258_v2  ;;  %v431_v2 = vsub.s32 4, %v4731_v15 }
 0x248   :  { %2965 = vmatprep.subr.bf16.mxu1 %v4263_v3  ;;  %v435_v3 = vsub.s32 5, %v4731_v15  ;;  %v3647_v15 = vld [vmem:[#allocation13] ss:$0 sm:$0xff] }
 0x24b   :  { %2966 = vmatpush1.bf16.msra.mxu1 %v4261_v4  ;;  %v432_v4 = vrot.slane %v4735_v18, %v431_v2 }
 0x24c   :  { %2967 = vmatprep.subr.bf16.mxu1 %v4266_v5  ;;  %v436_v5 = vrot.slane %v4735_v18, %v435_v3  ;;  %v4344_v18 = vld [vmem:[#allocation11 + $0x28] sm:$0xff]  }
 0x24d   :  { %3675 = vmatpush3.bf16.msra.mxu0 %v4344_v18 }
 0x24f   :  { %2968 = vmatpush1.bf16.msra.mxu1 %v4264_v7 }
 0x250   :  { %2969 = vmatprep.subr.bf16.mxu1 %v4269_v8 }
 0x253   :  { %2970 = vmatpush1.bf16.msra.mxu1 %v4267_v9 }
 0x254   :  { %2971 = vmatprep.subr.bf16.mxu1 %v4272_v10 }
 0x257   :  { %2972 = vmatpush1.bf16.msra.mxu1 %v4270_v11 }
 0x258   :  { %2973 = vmatprep.subr.bf16.mxu1 %v4275_v12 }
 0x25b   :  { %2974 = vmatpush1.bf16.msra.mxu1 %v4273_v13 }
 0x25c   :  { %2975 = vmatprep.subr.bf16.mxu1 %v4278_v14 }
 0x25f   :  { %2976 = vmatpush1.bf16.msra.mxu1 %v4276_v17 }
 0x260   :  { %2977 = vmatprep.subr.bf16.mxu1 %v4281_v20 }
 0x263   :  { %2978 = vmatpush1.bf16.msra.mxu1 %v4279_v21 }
 0x264   :  { %2979 = vmatprep.subr.bf16.mxu1 %v4284_v22 }
 0x267   :  { %2980 = vmatpush1.bf16.msra.mxu1 %v4282_v6 }
 0x268   :  { %2992 = vmatprep.subr.bf16.mxu1 %v4287_v23 }
 0x26a   :  { %2982 = vmatmul.mubr.bf16.vlgmr.msra.gmra.mrb[4].mxu1 %v2314_v48  ;;  %v4308_v48 = vld [vmem:[#allocation8 + $0x274] ss:$8 sps:$4 sm:$0xff]  }
 0x26b   :  { %2993 = vmatpush1.bf16.msra.mxu1 %v4285_v24  ;;  %v4345_v24 = vld [vmem:[#allocation11 + $0x70] sm:$0xff]  }
 0x26c   :  { %2994 = vmatprep.subr.bf16.mxu1 %v4290_v28  ;;  %3676 = vmatprep.subr.bf16.mxu0 %v4345_v24  ;;  %v2414_v28 = vld [vmem:[#allocation10] sm:$0x3] }
 0x26d   :  { %3677 = vmatpush3.bf16.msra.mxu0 %v4346_v25  ;;  %v2419_v29 = vrot.slane %v2414_v28, %v415_v16 }
 0x26e   :  { %3678 = vmatprep.subr.bf16.mxu0 %v4347_v26 }
 0x26f   :  { %2995 = vmatpush1.bf16.msra.mxu1 %v4288_v30  ;;  %v2423_v30 = vrot.slane %v2414_v28, %v419_v19 }
 0x270   :  { %2996 = vmatprep.subr.bf16.mxu1 %v4293_v32 }
 0x271   :  { %3679 = vmatpush3.bf16.msra.mxu0 %v4348_v27 }
 0x273   :  { %2997 = vmatpush1.bf16.msra.mxu1 %v4291_v34 }
 0x274   :  { %2998 = vmatprep.subr.bf16.mxu1 %v4296_v36 }
 0x277   :  { %2999 = vmatpush1.bf16.msra.mxu1 %v4294_v38 }
 0x278   :  { %3000 = vmatprep.subr.bf16.mxu1 %v4299_v40 }
 0x27b   :  { %3001 = vmatpush1.bf16.msra.mxu1 %v4297_v42 }
 0x27c   :  { %3002 = vmatprep.subr.bf16.mxu1 %v4302_v44 }
 0x27f   :  { %3003 = vmatpush1.bf16.msra.mxu1 %v4300_v45 }
 0x280   :  { %3004 = vmatprep.subr.bf16.mxu1 %v4305_v46 }
 0x283   :  { %3005 = vmatpush1.bf16.msra.mxu1 %v4303_v47 }
 0x284   :  { %3006 = vmatprep.subr.bf16.mxu1 %v4308_v48 }
 0x287   :  { %3007 = vmatpush1.bf16.msra.mxu1 %v4306_v49 }
 0x288   :  { %3008 = vmatprep.subr.bf16.mxu1 %v4311_v50 }
 0x28b   :  { %3009 = vmatpush1.bf16.msra.mxu1 %v4309_v51 }
 0x28c   :  { %3010 = vmatprep.subr.bf16.mxu1 %v4314_v52 }
 0x28f   :  { %3011 = vmatpush1.bf16.msra.mxu1 %v4312_v53 }
 0x290   :  { %3012 = vmatprep.subr.bf16.mxu1 %v4317_v54 }
 0x293   :  { %3013 = vmatpush1.bf16.msra.mxu1 %v4315_v55 }
 0x294   :  { %3014 = vmatprep.subr.bf16.mxu1 %v4320_v56 }
 0x297   :  { %3015 = vmatpush1.bf16.msra.mxu1 %v4318_v57 }
 0x298   :  { %3016 = vmatprep.subr.bf16.mxu1 %v4323_v58 }
 0x29b   :  { %3017 = vmatpush1.bf16.msra.mxu1 %v4321_v59 }
 0x29c   :  { %3018 = vmatprep.subr.bf16.mxu1 %v4326_v60 }
 0x29f   :  { %3019 = vmatpush1.bf16.msra.mxu1 %v4324_v61 }
 0x2a0   :  { %3020 = vmatprep.subr.bf16.mxu1 %v4329_v62 }
 0x2a3   :  { %3021 = vmatpush1.bf16.msra.mxu1 %v4327_v63 }
 0x2a4   :  { %3022 = vmatprep.subr.bf16.mxu1 %v4332_v0 }
 0x2a7   :  { %3023 = vmatpush1.bf16.msra.mxu1 %v4330_v1 }
 0x2d3   :  { %v2291_v7 = vpop.f32.mrb[4].mxu0 }
 0x2d4   :  { %v3694_v8 = vadd.f32 %v2291_v7, %v432_v4  ;;  %v2293_v9 = vpop.f32.mrb[5].mxu0 }
 0x2d5   :  { %v3695_v10 = vadd.f32 %v2293_v9, %v436_v5  ;;  %v2295_v11 = vpop.f32.mrb[6].mxu0 }
 0x2d6   :  { %4365 = vtanh.f32 %v3694_v8  ;;  %v3696_v12 = vadd.f32 %v2295_v11, %v432_v4  ;;  %v2297_v13 = vpop.f32.mrb[7].mxu0 }
 0x2d7   :  { %4367 = vtanh.f32 %v3695_v10  ;;  %v3697_v14 = vadd.f32 %v2297_v13, %v436_v5 }
 0x2d8   :  { %4369 = vtanh.f32 %v3696_v12 }
 0x2d9   :  { %4371 = vtanh.f32 %v3697_v14 }
 0x2e0   :  { %v4366_v17 = vpop.eup %4365 }
 0x2e1   :  { %v4368_v20 = vpop.eup %4367 }
 0x2e2   :  { %v4370_v21 = vpop.eup %4369 }
 0x2e3   :  { %v4372_v22 = vpop.eup %4371  ;;  %v2316_v6 = vpack.c.bf16 %v4370_v21, %v4366_v17 }
 0x2e4   :  { %v2317_v23 = vpack.c.bf16 %v4372_v22, %v4368_v20 }
 0x2e6   :  { %3024 = vmatprep.mubr.bf16.mxu1 %v2317_v23 }
 0x2e7   :  { %3025 = vmatmul.mubr.bf16.vlgmr.msra.gmra.mrb[4].mxu1 %v2316_v6 }
 0x3ba   :  { %v3026_v31 = vpop.f32.mrb[4].mxu1 }
 0x3bb   :  { %v3698_v32 = vadd.f32 %v3026_v31, %v2419_v29  ;;  %v3028_v33 = vpop.f32.mrb[5].mxu1 }
 0x3bc   :  { %v3699_v34 = vadd.f32 %v3028_v33, %v2423_v30  ;;  %v3030_v35 = vpop.f32.mrb[6].mxu1 }
 0x3bd   :  { %v3700_v36 = vadd.f32 %v3030_v35, %v2419_v29  ;;  %v3032_v37 = vpop.f32.mrb[7].mxu1  ;;  %v3035_v39 = vmax.f32 %v3698_v32, 0.0 }
 0x3be   :  { %v3701_v38 = vadd.f32 %v3032_v37, %v2423_v30  ;;  %v3036_v41 = vmax.f32 %v3699_v34, 0.0 }
 0x3bf   :  { %v3037_v40 = vmax.f32 %v3700_v36, 0.0 }
 0x3c0   :  { %v3038_v42 = vmax.f32 %v3701_v38, 0.0 }
 0x3c1   :  { %v3039_v43 = vpack.c.bf16 %v3037_v40, %v3035_v39 }
 0x3c2   :  { %v3040_v44 = vpack.c.bf16 %v3038_v42, %v3036_v41 }
 0x3c4   :  { %3208 = vmatprep.mubr.bf16.mxu0 %v3040_v44 }
 0x3c5   :  { %3209 = vmatmul.mubr.bf16.vlgmr.msra.gmra.mrb[8].mxu0 %v3039_v43 }
 0x498   :  { %v3680_v16 = vpop.f32.mrb[8].mxu0 }
 0x499   :  { %v3681_v45 = vpop.f32.mrb[9].mxu0 }
 0x49a   :  { %v3682_v19 = vadd.f32 %v3681_v45, %v3680_v16  ;;  %v3683_v46 = vpop.f32.mrb[10].mxu0 }
 0x49b   :  { %v3684_v47 = vpop.f32.mrb[11].mxu0 }
 0x49c   :  { %v3685_v48 = vadd.f32 %v3684_v47, %v3683_v46  ;;  %v3211_v49 = vadd.f32 %v3682_v19, %v3647_v15 }
 0x49e   :  { %3217 = vmax.xlane.f32.xlu0 %v3211_v49  ;;  %v3214_v50 = vadd.f32 %v3685_v48, %v3647_v15 }
 0x4a2   :  { %3219 = vmax.xlane.f32.xlu0 %v3214_v50 }
 0x52b   :  { %v3218_v51 = vpop.xlane.xlu0 %3217 }
 0x52c   :  { %v3221_v52 = vsub.f32 %v3211_v49, %v3218_v51 }
 0x52e   :  { %v3223_v53 = vmul.f32 1.442695, %v3221_v52 }
 0x52f   :  { %v3220_v54 = vpop.xlane.xlu0 %3219 }
 0x530   :  { %4373 = vpow2.f32 %v3223_v53  ;;  %v3222_v55 = vsub.f32 %v3214_v50, %v3220_v54 }
 0x532   :  { %v3225_v56 = vmul.f32 1.442695, %v3222_v55 }
 0x534   :  { %4375 = vpow2.f32 %v3225_v56 }
 0x53a   :  { %v4374_v57 = vpop.eup %4373 }
 0x53b   :  { %3227 = vadd.xlane.f32.xlu1 %v4374_v57 }
 0x53e   :  { %v4376_v58 = vpop.eup %4375 }
 0x53f   :  { %3229 = vadd.xlane.f32.xlu1 %v4376_v58 }
 0x5c8   :  { %v3228_v59 = vpop.xlane.xlu1 %3227 }
 0x5c9   :  { %4377 = vrcp.f32 %v3228_v59 }
 0x5cc   :  { %v3230_v60 = vpop.xlane.xlu1 %3229 }
 0x5cd   :  { %4379 = vrcp.f32 %v3230_v60 }
 0x5d3   :  { %v4378_v61 = vpop.eup %4377 }
 0x5d4   :  { %v3233_v62 = vmul.f32 %v4378_v61, %v4374_v57 }
 0x5d6   :  { %3235 = vst [vmem:[#allocation14] sm:$0xff] %v3233_v62 }
 0x5d7   :  { %v4380_v63 = vpop.eup %4379 }
 0x5d8   :  { %v3234_v0 = vmul.f32 %v4380_v63, %v4376_v58 }
 0x5da   :  { %3236 = vst [vmem:[#allocation14 + $0x8] sm:$0xff] %v3234_v0 }
 0x5db   :  { %4551 = shalt.err (!%p4548_p4)
}
 0x5dc   :  { %s4552_s21 = scalar_lea.hbm %s4786_s7, 256 }
 0x5dd   :  { %p4553_p5 = scmp.ne.s32.totalorder %s4786_s7, %s4552_s21  ;;  %p4556_p6 = scmp.lt.u32.totalorder %s4552_s21, %s4786_s7 }
 0x5df   :  { %p4558_p7 = pnand %p4556_p6, %p4553_p5 }
 0x5e1   :  { %4561 = shalt.err (!%p4558_p7)
}
 0x5e2   :  { %3248 = dma.vmem_to_hbm [thread:$0]  %s3243_s0, 256, %s4786_s7, [#allocation4], %s4576_s1, %s4576_s1, %s4577_s25  }
 0x5e3   :  { %4570 = dma.done.wait [#allocation4], 256  }
 0x5e4   :  { %4571 = vsyncadd [#allocation4], 4294967040 }
 0x5e5   :  { %3252 = vsyncpa [#allocation3], 1 }
 0x5e6   :  { %3253 = vsyncpa [#allocation6], 1 }
 0x5e7   :  { %3254 = vsyncpa [#allocation9], 1 }
 0x5e8   :  { %3255 = vsyncpa [#allocation12], 1 }
 0x5e9   :  { %3256 = vsyncpa [#allocation4], 1 }

</bundles_post_ra>
